<compile_context>
chip_gen: v6e
topology: v6e:2x2x1
jax: 0.10.0
libtpu: 0.0.40
codegen_flags: <defaults>
</compile_context>

<pallas_src>
import math
from functools import partial

import jax
import jax.numpy as jnp
from jax.experimental import pallas as pl
from jax.experimental.pallas import tpu as pltpu


# ------------------------------ fused kernel ------------------------------

def _act_encoder_kernel(B, L, D, H, activation, pre_norm, eps,
                        x0_ref, pos_ref, kpm_ref,
                        w_in_ref, b_in_ref, w_out_ref, b_out_ref,
                        w1_ref, b1_ref, w2_ref, b2_ref,
                        n1g_ref, n1b_ref, n2g_ref, n2b_ref,
                        fng_ref, fnb_ref,
                        o_ref):
    """One grid step == one ACTEncoderLayer.  Hidden state carried in o_ref."""
    Dh = D // H
    scale = 1.0 / math.sqrt(Dh)
    li = pl.program_id(0)
    n_layers = pl.num_programs(0)

    # Seed the VMEM-resident state with the input tokens at the first layer.
    @pl.when(li == 0)
    def _():
        o_ref[...] = x0_ref[...]

    x = o_ref[...]                          # (M, D), rows batch-major (b*L + l)
    pos = pos_ref[...]                      # (M, D)
    neg_mask = kpm_ref[...] * (-1e30)       # (B, L); -1e30 where key is padded
    # NOTE: PyTorch uses -inf; -1e30 differs only for fully-masked rows
    # (uniform weights instead of NaN).

    def ln(v, g_ref, b_ref):
        mu = jnp.mean(v, axis=-1, keepdims=True)
        var = jnp.mean((v - mu) ** 2, axis=-1, keepdims=True)
        return (v - mu) * jax.lax.rsqrt(var + eps) * g_ref[...] + b_ref[...]

    # ---------------- self attention ----------------
    skip = x
    if pre_norm:
        x = ln(x, n1g_ref, n1b_ref)
    xp = x + pos                             # q/k input; value input is x

    w_in = w_in_ref[...]                     # (D, 3D)  == in_proj_weight.T
    b_in = b_in_ref[...]                     # (1, 3D)
    # Fused Q/K GEMM on (x + pos); V GEMM on x.
    qk = jnp.dot(xp, w_in[:, :2 * D],
                 preferred_element_type=jnp.float32) + b_in[:, :2 * D]
    v = jnp.dot(x, w_in[:, 2 * D:],
                preferred_element_type=jnp.float32) + b_in[:, 2 * D:]
    q = qk[:, :D]
    k = qk[:, D:]
    w_out = w_out_ref[...]                   # (D, D)  == out_proj.weight.T

    per_batch = []
    for b in range(B):                       # B, H are tiny & static → unrolled
        qb = q[b * L:(b + 1) * L, :]
        kb = k[b * L:(b + 1) * L, :]
        vb = v[b * L:(b + 1) * L, :]
        mb = neg_mask[b:b + 1, :]            # (1, L) broadcast over queries
        acc = None
        for h in range(H):
            sl = slice(h * Dh, (h + 1) * Dh)
            # scores = q_h @ k_h^T  (NT matmul, no explicit transpose)
            s = jax.lax.dot_general(qb[:, sl], kb[:, sl],
                                    (((1,), (1,)), ((), ())),
                                    preferred_element_type=jnp.float32)
            s = s * scale + mb
            s = s - jnp.max(s, axis=-1, keepdims=True)
            e = jnp.exp(s)
            p = e * pl.reciprocal(jnp.sum(e, axis=-1, keepdims=True),
                                  approx=True)
            oh = jnp.dot(p, vb[:, sl], preferred_element_type=jnp.float32)
            # Fold the output projection in per head:
            #   attn_out = sum_h o_h @ Wout.T[h*Dh:(h+1)*Dh, :]
            contrib = jnp.dot(oh, w_out[sl, :],
                              preferred_element_type=jnp.float32)
            acc = contrib if acc is None else acc + contrib
        per_batch.append(acc)                # (L, D)
    attn = jnp.concatenate(per_batch, axis=0) + b_out_ref[...]   # (M, D)

    x = skip + attn
    if pre_norm:
        skip = x
        x = ln(x, n2g_ref, n2b_ref)
    else:
        x = ln(x, n1g_ref, n1b_ref)
        skip = x

    # ---------------- feed forward ----------------
    h1 = jnp.dot(x, w1_ref[...], preferred_element_type=jnp.float32) + b1_ref[...]
    if activation == "relu":
        h1 = jnp.maximum(h1, 0.0)
    elif activation == "gelu":
        h1 = jax.nn.gelu(h1, approximate=False)   # exact erf form == F.gelu
    # TODO(synk): 'glu' activation not implemented (changes linear2 fan-in).
    y = jnp.dot(h1, w2_ref[...], preferred_element_type=jnp.float32) + b2_ref[...]
    x = skip + y
    if not pre_norm:
        x = ln(x, n2g_ref, n2b_ref)

    if pre_norm:
        # ACTEncoder applies a final LayerNorm only in pre_norm mode.
        @pl.when(li == n_layers - 1)
        def _():
            o_ref[...] = ln(x, fng_ref, fnb_ref)

        @pl.when(li < n_layers - 1)
        def _():
            o_ref[...] = x
    else:
        o_ref[...] = x


# ------------------------------ forward wrapper ------------------------------

def act_encoder_forward(packed, x, pos_embed, key_padding_mask, cfg):
    """x: (L, B, D) seq-first (PyTorch MHA convention). Returns (L, B, D)."""
    L, B, D = x.shape
    N = cfg["n_encoder_layers"]
    H = cfg["n_heads"]
    FF = cfg["dim_feedforward"]
    assert D % H == 0
    assert cfg["activation"] in ("relu", "gelu")
    M = B * L

    # Batch-major rows so per-(batch) slices are contiguous inside the kernel.
    xb = jnp.transpose(x, (1, 0, 2)).reshape(M, D).astype(jnp.float32)
    if pos_embed is None:
        posb = jnp.zeros((M, D), jnp.float32)
    else:
        posb = jnp.broadcast_to(jnp.transpose(pos_embed, (1, 0, 2)),
                                (B, L, D)).reshape(M, D).astype(jnp.float32)
    if key_padding_mask is None:
        kpm = jnp.zeros((B, L), jnp.float32)
    else:
        kpm = key_padding_mask.astype(jnp.float32)      # 1.0 == masked key

    def full_spec(*shape):
        return pl.BlockSpec(shape, lambda l: (0,) * len(shape))

    def layer_spec(*shape):
        return pl.BlockSpec((None,) + shape, lambda l: (l,) + (0,) * len(shape))

    kernel = partial(_act_encoder_kernel, B, L, D, H,
                     cfg["activation"], cfg["pre_norm"], 1e-5)

    out = pl.pallas_call(
        kernel,
        out_shape=jax.ShapeDtypeStruct((M, D), jnp.float32),
        grid=(N,),
        in_specs=[
            full_spec(M, D),            # x0 (tokens)
            full_spec(M, D),            # pos embed (broadcast over batch)
            full_spec(B, L),            # key padding mask
            layer_spec(D, 3 * D),       # in_proj weight (transposed)
            layer_spec(1, 3 * D),       # in_proj bias
            layer_spec(D, D),           # out_proj weight (transposed)
            layer_spec(1, D),           # out_proj bias
            layer_spec(D, FF),          # linear1 weight (transposed)
            layer_spec(1, FF),          # linear1 bias
            layer_spec(FF, D),          # linear2 weight (transposed)
            layer_spec(1, D),           # linear2 bias
            layer_spec(1, D),           # norm1 gamma
            layer_spec(1, D),           # norm1 beta
            layer_spec(1, D),           # norm2 gamma
            layer_spec(1, D),           # norm2 beta
            full_spec(1, D),            # final norm gamma (pre_norm only)
            full_spec(1, D),            # final norm beta
        ],
        out_specs=full_spec(M, D),
        compiler_params=pltpu.CompilerParams(
            dimension_semantics=("arbitrary",)),
    )(xb, posb, kpm,
      packed["w_in_t"], packed["b_in"], packed["w_out_t"], packed["b_out"],
      packed["w1_t"], packed["b1"], packed["w2_t"], packed["b2"],
      packed["n1g"], packed["n1b"], packed["n2g"], packed["n2b"],
      packed["fng"], packed["fnb"])

    return jnp.transpose(out.reshape(B, L, D), (1, 0, 2))


# ----------------------- params (PyTorch layout) + packing -----------------------

class KeyGen:
    def __init__(self, key):
        self._key = key

    def __call__(self):
        self._key, sub = jax.random.split(self._key)
        return sub


def xavier(key, shape):
    fan_out, fan_in = shape
    lim = math.sqrt(6.0 / (fan_in + fan_out))
    return jax.random.uniform(key, shape, jnp.float32, -lim, lim)


def init_layer(kg, D, FF):
    return {
        "in_w": xavier(kg(), (3 * D, D)),
        "in_b": jnp.zeros((3 * D,), jnp.float32),
        "out_w": xavier(kg(), (D, D)),
        "out_b": jnp.zeros((D,), jnp.float32),
        "lin1_w": xavier(kg(), (FF, D)),
        "lin1_b": jnp.zeros((FF,), jnp.float32),
        "lin2_w": xavier(kg(), (D, FF)),
        "lin2_b": jnp.zeros((D,), jnp.float32),
        "norm1_g": jnp.ones((D,), jnp.float32),
        "norm1_b": jnp.zeros((D,), jnp.float32),
        "norm2_g": jnp.ones((D,), jnp.float32),
        "norm2_b": jnp.zeros((D,), jnp.float32),
    }


def pack_params(layers, final_g, final_b):
    """Stack per-layer PyTorch-layout params; pre-transpose weights ONCE."""
    st = lambda k, f: jnp.stack([f(p[k]) for p in layers])
    row = lambda a: a.reshape(1, -1)
    return {
        "w_in_t": st("in_w", lambda a: a.T),     # (N, D, 3D)
        "b_in": st("in_b", row),                 # (N, 1, 3D)
        "w_out_t": st("out_w", lambda a: a.T),   # (N, D, D)
        "b_out": st("out_b", row),
        "w1_t": st("lin1_w", lambda a: a.T),     # (N, D, FF)
        "b1": st("lin1_b", row),
        "w2_t": st("lin2_w", lambda a: a.T),     # (N, FF, D)
        "b2": st("lin2_b", row),
        "n1g": st("norm1_g", row), "n1b": st("norm1_b", row),
        "n2g": st("norm2_g", row), "n2b": st("norm2_b", row),
        "fng": final_g.reshape(1, -1), "fnb": final_b.reshape(1, -1),
    }


# ------------------------------ pure-JAX reference ------------------------------

def reference_forward(layers, final_g, final_b, x, pos_embed, key_padding_mask, cfg):
    L, B, D = x.shape
    H = cfg["n_heads"]
    Dh = D // H
    pre_norm = cfg["pre_norm"]

    def ln(v, g, b, eps=1e-5):
        mu = v.mean(-1, keepdims=True)
        var = ((v - mu) ** 2).mean(-1, keepdims=True)
        return (v - mu) * jax.lax.rsqrt(var + eps) * g + b

    def mha(q_in, k_in, v_in, ap):
        w, bw = ap["in_w"], ap["in_b"]
        q = q_in @ w[:D].T + bw[:D]
        k = k_in @ w[D:2 * D].T + bw[D:2 * D]
        v = v_in @ w[2 * D:].T + bw[2 * D:]
        split = lambda t: t.reshape(L, B, H, Dh).transpose(1, 2, 0, 3)
        qh, kh, vh = split(q), split(k), split(v)
        s = jnp.einsum("bhqd,bhkd->bhqk", qh, kh) / math.sqrt(Dh)
        if key_padding_mask is not None:
            s = s + jnp.where(key_padding_mask, -1e30, 0.0)[:, None, None, :]
        p_att = jax.nn.softmax(s, axis=-1)
        o = jnp.einsum("bhqk,bhkd->bhqd", p_att, vh)
        o = o.transpose(2, 0, 1, 3).reshape(L, B, D)
        return o @ ap["out_w"].T + ap["out_b"]

    for p in layers:
        skip = x
        if pre_norm:
            x = ln(x, p["norm1_g"], p["norm1_b"])
        qk = x if pos_embed is None else x + pos_embed
        x = skip + mha(qk, qk, x, p)
        if pre_norm:
            skip = x
            x = ln(x, p["norm2_g"], p["norm2_b"])
        else:
            x = ln(x, p["norm1_g"], p["norm1_b"])
            skip = x
        h = x @ p["lin1_w"].T + p["lin1_b"]
        h = jnp.maximum(h, 0.0) if cfg["activation"] == "relu" \
            else jax.nn.gelu(h, approximate=False)
        x = skip + (h @ p["lin2_w"].T + p["lin2_b"])
        if not pre_norm:
            x = ln(x, p["norm2_g"], p["norm2_b"])
    if pre_norm:
        x = ln(x, final_g, final_b)
    return x


# ----------------------------------- main -----------------------------------

if __name__ == "__main__":
    cfg = {
        "dim_model": 32,
        "n_heads": 4,
        "dim_feedforward": 64,
        "activation": "relu",
        "pre_norm": False,
        "n_encoder_layers": 3,
        "dropout": 0.0,          # eval mode: dropout == identity
    }
    L, B = 8, 2
    D = cfg["dim_model"]

    kg = KeyGen(jax.random.PRNGKey(0))
    layers = [init_layer(kg, D, cfg["dim_feedforward"])
              for _ in range(cfg["n_encoder_layers"])]
    final_g = jnp.ones((D,), jnp.float32)
    final_b = jnp.zeros((D,), jnp.float32)
    packed = pack_params(layers, final_g, final_b)

    x = jax.random.normal(kg(), (L, B, D), jnp.float32)
    pos = 0.02 * jax.random.normal(kg(), (L, 1, D), jnp.float32)
    kpm = jax.random.uniform(kg(), (B, L)) > 0.7
    kpm = kpm.at[:, 0].set(False)        # keep at least one unmasked key per row

    for pre_norm in (False, True):       # exercise both post-norm and pre-norm paths
        cfg_i = dict(cfg, pre_norm=pre_norm)
        fwd = jax.jit(partial(act_encoder_forward, cfg=cfg_i))
        y = fwd(packed, x, pos, kpm)
        jax.block_until_ready(y)
        assert y.shape == (L, B, D)
        assert bool(jnp.all(jnp.isfinite(y)))
        y_ref = reference_forward(layers, final_g, final_b, x, pos, kpm, cfg_i)
        err = float(jnp.max(jnp.abs(y - y_ref)))
        assert err < 5e-2, f"mismatch vs pure-JAX reference: {err}"

    print("KERNEL_OK")
</pallas_src>

<mosaic_0001>
module attributes {stable_mosaic.version = 11 : i64} {
  func.func @_act_encoder_kernel(%arg0: i32, %arg1: memref<16x32xf32, #tpu.memory_space<vmem>>, %arg2: memref<16x32xf32, #tpu.memory_space<vmem>>, %arg3: memref<2x8xf32, #tpu.memory_space<vmem>>, %arg4: memref<1x32x96xf32, #tpu.memory_space<vmem>>, %arg5: memref<1x1x96xf32, #tpu.memory_space<vmem>>, %arg6: memref<1x32x32xf32, #tpu.memory_space<vmem>>, %arg7: memref<1x1x32xf32, #tpu.memory_space<vmem>>, %arg8: memref<1x32x64xf32, #tpu.memory_space<vmem>>, %arg9: memref<1x1x64xf32, #tpu.memory_space<vmem>>, %arg10: memref<1x64x32xf32, #tpu.memory_space<vmem>>, %arg11: memref<1x1x32xf32, #tpu.memory_space<vmem>>, %arg12: memref<1x1x32xf32, #tpu.memory_space<vmem>>, %arg13: memref<1x1x32xf32, #tpu.memory_space<vmem>>, %arg14: memref<1x1x32xf32, #tpu.memory_space<vmem>>, %arg15: memref<1x1x32xf32, #tpu.memory_space<vmem>>, %arg16: memref<1x32xf32, #tpu.memory_space<vmem>>, %arg17: memref<1x32xf32, #tpu.memory_space<vmem>>, %arg18: memref<16x32xf32, #tpu.memory_space<vmem>>) attributes {dimension_semantics = [#tpu.dimension_semantics<arbitrary>], iteration_bounds = array<i64: 3>, scalar_prefetch = 0 : i64, scratch_operands = 0 : i64, tpu.core_type = #tpu.core_type<tc>, window_params = [{pipeline_mode = #tpu.pipeline_mode<synchronous>, transform_indices = @transform_0, window_bounds = array<i64: 16, 32>}, {pipeline_mode = #tpu.pipeline_mode<synchronous>, transform_indices = @transform_1, window_bounds = array<i64: 16, 32>}, {pipeline_mode = #tpu.pipeline_mode<synchronous>, transform_indices = @transform_2, window_bounds = array<i64: 2, 8>}, {transform_indices = @transform_3, window_bounds = array<i64: 1, 32, 96>}, {transform_indices = @transform_4, window_bounds = array<i64: 1, 1, 96>}, {transform_indices = @transform_5, window_bounds = array<i64: 1, 32, 32>}, {transform_indices = @transform_6, window_bounds = array<i64: 1, 1, 32>}, {transform_indices = @transform_7, window_bounds = array<i64: 1, 32, 64>}, {transform_indices = @transform_8, window_bounds = array<i64: 1, 1, 64>}, {transform_indices = @transform_9, window_bounds = array<i64: 1, 64, 32>}, {transform_indices = @transform_10, window_bounds = array<i64: 1, 1, 32>}, {transform_indices = @transform_11, window_bounds = array<i64: 1, 1, 32>}, {transform_indices = @transform_12, window_bounds = array<i64: 1, 1, 32>}, {transform_indices = @transform_13, window_bounds = array<i64: 1, 1, 32>}, {transform_indices = @transform_14, window_bounds = array<i64: 1, 1, 32>}, {pipeline_mode = #tpu.pipeline_mode<synchronous>, transform_indices = @transform_15, window_bounds = array<i64: 1, 32>}, {pipeline_mode = #tpu.pipeline_mode<synchronous>, transform_indices = @transform_16, window_bounds = array<i64: 1, 32>}, {pipeline_mode = #tpu.pipeline_mode<synchronous>, transform_indices = @transform_17, window_bounds = array<i64: 16, 32>}]} {
    %c0_i32 = arith.constant 0 : i32
    %0 = arith.cmpi eq, %arg0, %c0_i32 : i32
    %1 = arith.extui %0 : i1 to i32
    %c0_i32_0 = arith.constant 0 : i32
    %2 = arith.cmpi ne, %1, %c0_i32_0 : i32
    scf.if %2 {
      %c0_107 = arith.constant 0 : index
      %c0_108 = arith.constant 0 : index
      %285 = vector.load %arg1[%c0_107, %c0_108] : memref<16x32xf32, #tpu.memory_space<vmem>>, vector<16x32xf32>
      %c0_109 = arith.constant 0 : index
      %c0_110 = arith.constant 0 : index
      %286 = vector.load %arg18[%c0_109, %c0_110] : memref<16x32xf32, #tpu.memory_space<vmem>>, vector<16x32xf32>
      tpu.vector_store %arg18[%c0_109, %c0_110], %285 {strides = array<i32>} : memref<16x32xf32, #tpu.memory_space<vmem>>, vector<16x32xf32>,
    } else {
    }
    %c0 = arith.constant 0 : index
    %c0_1 = arith.constant 0 : index
    %3 = vector.load %arg18[%c0, %c0_1] : memref<16x32xf32, #tpu.memory_space<vmem>>, vector<16x32xf32>
    %c0_2 = arith.constant 0 : index
    %c0_3 = arith.constant 0 : index
    %4 = vector.load %arg2[%c0_2, %c0_3] : memref<16x32xf32, #tpu.memory_space<vmem>>, vector<16x32xf32>
    %c0_4 = arith.constant 0 : index
    %c0_5 = arith.constant 0 : index
    %5 = vector.load %arg3[%c0_4, %c0_5] : memref<2x8xf32, #tpu.memory_space<vmem>>, vector<2x8xf32>
    %cst = arith.constant -1.000000e+30 : f32
    %6 = vector.broadcast %cst : f32 to vector<2x8xf32>
    %7 = arith.mulf %5, %6 : vector<2x8xf32>
    %8 = arith.addf %3, %4 : vector<16x32xf32>
    %c0_6 = arith.constant 0 : index
    %c0_7 = arith.constant 0 : index
    %c0_8 = arith.constant 0 : index
    %9 = vector.load %arg4[%c0_6, %c0_7, %c0_8] : memref<1x32x96xf32, #tpu.memory_space<vmem>>, vector<1x32x96xf32>
    %10 = vector.shape_cast %9 : vector<1x32x96xf32> to vector<32x96xf32>
    %c0_9 = arith.constant 0 : index
    %c0_10 = arith.constant 0 : index
    %c0_11 = arith.constant 0 : index
    %11 = vector.load %arg5[%c0_9, %c0_10, %c0_11] : memref<1x1x96xf32, #tpu.memory_space<vmem>>, vector<1x1x96xf32>
    %12 = vector.shape_cast %11 : vector<1x1x96xf32> to vector<1x96xf32>
    %13 = vector.extract_strided_slice %10 {offsets = [0, 0], sizes = [32, 64], strides = [1, 1]} : vector<32x96xf32> to vector<32x64xf32>
    %cst_12 = arith.constant dense<0.000000e+00> : vector<16x64xf32>
    %14 = tpu.matmul %8, %13, %cst_12 {dimension_numbers = #tpu.dot_dimension_numbers<[1], [0], [0], [1], [0, 0, 1, 1], [], []>} : vector<16x32xf32>, vector<32x64xf32>, vector<16x64xf32> -> vector<16x64xf32>
    %15 = vector.extract_strided_slice %12 {offsets = [0, 0], sizes = [1, 64], strides = [1, 1]} : vector<1x96xf32> to vector<1x64xf32>
    %16 = vector.broadcast %15 : vector<1x64xf32> to vector<16x64xf32>
    %17 = arith.addf %14, %16 : vector<16x64xf32>
    %18 = vector.extract_strided_slice %10 {offsets = [0, 64], sizes = [32, 32], strides = [1, 1]} : vector<32x96xf32> to vector<32x32xf32>
    %cst_13 = arith.constant dense<0.000000e+00> : vector<16x32xf32>
    %19 = tpu.matmul %3, %18, %cst_13 {dimension_numbers = #tpu.dot_dimension_numbers<[1], [0], [0], [1], [0, 0, 1, 1], [], []>} : vector<16x32xf32>, vector<32x32xf32>, vector<16x32xf32> -> vector<16x32xf32>
    %20 = vector.extract_strided_slice %12 {offsets = [0, 64], sizes = [1, 32], strides = [1, 1]} : vector<1x96xf32> to vector<1x32xf32>
    %21 = vector.broadcast %20 : vector<1x32xf32> to vector<16x32xf32>
    %22 = arith.addf %19, %21 : vector<16x32xf32>
    %23 = vector.extract_strided_slice %17 {offsets = [0, 0], sizes = [16, 32], strides = [1, 1]} : vector<16x64xf32> to vector<16x32xf32>
    %24 = vector.extract_strided_slice %17 {offsets = [0, 32], sizes = [16, 32], strides = [1, 1]} : vector<16x64xf32> to vector<16x32xf32>
    %c0_14 = arith.constant 0 : index
    %c0_15 = arith.constant 0 : index
    %c0_16 = arith.constant 0 : index
    %25 = vector.load %arg6[%c0_14, %c0_15, %c0_16] : memref<1x32x32xf32, #tpu.memory_space<vmem>>, vector<1x32x32xf32>
    %26 = vector.shape_cast %25 : vector<1x32x32xf32> to vector<32x32xf32>
    %27 = vector.extract_strided_slice %23 {offsets = [0, 0], sizes = [8, 32], strides = [1, 1]} : vector<16x32xf32> to vector<8x32xf32>
    %28 = vector.extract_strided_slice %24 {offsets = [0, 0], sizes = [8, 32], strides = [1, 1]} : vector<16x32xf32> to vector<8x32xf32>
    %29 = vector.extract_strided_slice %22 {offsets = [0, 0], sizes = [8, 32], strides = [1, 1]} : vector<16x32xf32> to vector<8x32xf32>
    %30 = vector.extract_strided_slice %7 {offsets = [0, 0], sizes = [1, 8], strides = [1, 1]} : vector<2x8xf32> to vector<1x8xf32>
    %31 = vector.extract_strided_slice %27 {offsets = [0, 0], sizes = [8, 8], strides = [1, 1]} : vector<8x32xf32> to vector<8x8xf32>
    %32 = vector.extract_strided_slice %28 {offsets = [0, 0], sizes = [8, 8], strides = [1, 1]} : vector<8x32xf32> to vector<8x8xf32>
    %cst_17 = arith.constant dense<0.000000e+00> : vector<8x8xf32>
    %33 = tpu.matmul %31, %32, %cst_17 {dimension_numbers = #tpu.dot_dimension_numbers<[1], [1], [0], [0], [0, 0, 1, 0], [], []>} : vector<8x8xf32>, vector<8x8xf32>, vector<8x8xf32> -> vector<8x8xf32>
    %cst_18 = arith.constant 0.353553385 : f32
    %34 = vector.broadcast %cst_18 : f32 to vector<8x8xf32>
    %35 = arith.mulf %33, %34 : vector<8x8xf32>
    %36 = vector.broadcast %30 : vector<1x8xf32> to vector<8x8xf32>
    %37 = arith.addf %35, %36 : vector<8x8xf32>
    %cst_19 = arith.constant dense<0xFF800000> : vector<8xf32>
    %38 = vector.multi_reduction <maximumf>, %37, %cst_19 [1] : vector<8x8xf32> to vector<8xf32>
    %39 = vector.shape_cast %38 : vector<8xf32> to vector<8x1xf32>
    %40 = vector.broadcast %39 : vector<8x1xf32> to vector<8x8xf32>
    %41 = arith.subf %37, %40 : vector<8x8xf32>
    %42 = math.exp %41 : vector<8x8xf32>
    %cst_20 = arith.constant dense<0.000000e+00> : vector<8xf32>
    %43 = vector.multi_reduction <add>, %42, %cst_20 [1] : vector<8x8xf32> to vector<8xf32>
    %44 = vector.shape_cast %43 : vector<8xf32> to vector<8x1xf32>
    %45 = tpu.reciprocal %44 {approx = true} : vector<8x1xf32> -> vector<8x1xf32>
    %46 = vector.broadcast %45 : vector<8x1xf32> to vector<8x8xf32>
    %47 = arith.mulf %42, %46 : vector<8x8xf32>
    %48 = vector.extract_strided_slice %29 {offsets = [0, 0], sizes = [8, 8], strides = [1, 1]} : vector<8x32xf32> to vector<8x8xf32>
    %cst_21 = arith.constant dense<0.000000e+00> : vector<8x8xf32>
    %49 = tpu.matmul %47, %48, %cst_21 {dimension_numbers = #tpu.dot_dimension_numbers<[1], [0], [0], [1], [0, 0, 1, 1], [], []>} : vector<8x8xf32>, vector<8x8xf32>, vector<8x8xf32> -> vector<8x8xf32>
    %50 = vector.extract_strided_slice %26 {offsets = [0, 0], sizes = [8, 32], strides = [1, 1]} : vector<32x32xf32> to vector<8x32xf32>
    %cst_22 = arith.constant dense<0.000000e+00> : vector<8x32xf32>
    %51 = tpu.matmul %49, %50, %cst_22 {dimension_numbers = #tpu.dot_dimension_numbers<[1], [0], [0], [1], [0, 0, 1, 1], [], []>} : vector<8x8xf32>, vector<8x32xf32>, vector<8x32xf32> -> vector<8x32xf32>
    %52 = vector.extract_strided_slice %27 {offsets = [0, 8], sizes = [8, 8], strides = [1, 1]} : vector<8x32xf32> to vector<8x8xf32>
    %53 = vector.extract_strided_slice %28 {offsets = [0, 8], sizes = [8, 8], strides = [1, 1]} : vector<8x32xf32> to vector<8x8xf32>
    %cst_23 = arith.constant dense<0.000000e+00> : vector<8x8xf32>
    %54 = tpu.matmul %52, %53, %cst_23 {dimension_numbers = #tpu.dot_dimension_numbers<[1], [1], [0], [0], [0, 0, 1, 0], [], []>} : vector<8x8xf32>, vector<8x8xf32>, vector<8x8xf32> -> vector<8x8xf32>
    %cst_24 = arith.constant 0.353553385 : f32
    %55 = vector.broadcast %cst_24 : f32 to vector<8x8xf32>
    %56 = arith.mulf %54, %55 : vector<8x8xf32>
    %57 = vector.broadcast %30 : vector<1x8xf32> to vector<8x8xf32>
    %58 = arith.addf %56, %57 : vector<8x8xf32>
    %cst_25 = arith.constant dense<0xFF800000> : vector<8xf32>
    %59 = vector.multi_reduction <maximumf>, %58, %cst_25 [1] : vector<8x8xf32> to vector<8xf32>
    %60 = vector.shape_cast %59 : vector<8xf32> to vector<8x1xf32>
    %61 = vector.broadcast %60 : vector<8x1xf32> to vector<8x8xf32>
    %62 = arith.subf %58, %61 : vector<8x8xf32>
    %63 = math.exp %62 : vector<8x8xf32>
    %cst_26 = arith.constant dense<0.000000e+00> : vector<8xf32>
    %64 = vector.multi_reduction <add>, %63, %cst_26 [1] : vector<8x8xf32> to vector<8xf32>
    %65 = vector.shape_cast %64 : vector<8xf32> to vector<8x1xf32>
    %66 = tpu.reciprocal %65 {approx = true} : vector<8x1xf32> -> vector<8x1xf32>
    %67 = vector.broadcast %66 : vector<8x1xf32> to vector<8x8xf32>
    %68 = arith.mulf %63, %67 : vector<8x8xf32>
    %69 = vector.extract_strided_slice %29 {offsets = [0, 8], sizes = [8, 8], strides = [1, 1]} : vector<8x32xf32> to vector<8x8xf32>
    %cst_27 = arith.constant dense<0.000000e+00> : vector<8x8xf32>
    %70 = tpu.matmul %68, %69, %cst_27 {dimension_numbers = #tpu.dot_dimension_numbers<[1], [0], [0], [1], [0, 0, 1, 1], [], []>} : vector<8x8xf32>, vector<8x8xf32>, vector<8x8xf32> -> vector<8x8xf32>
    %71 = vector.extract_strided_slice %26 {offsets = [8, 0], sizes = [8, 32], strides = [1, 1]} : vector<32x32xf32> to vector<8x32xf32>
    %cst_28 = arith.constant dense<0.000000e+00> : vector<8x32xf32>
    %72 = tpu.matmul %70, %71, %cst_28 {dimension_numbers = #tpu.dot_dimension_numbers<[1], [0], [0], [1], [0, 0, 1, 1], [], []>} : vector<8x8xf32>, vector<8x32xf32>, vector<8x32xf32> -> vector<8x32xf32>
    %73 = arith.addf %51, %72 : vector<8x32xf32>
    %74 = vector.extract_strided_slice %27 {offsets = [0, 16], sizes = [8, 8], strides = [1, 1]} : vector<8x32xf32> to vector<8x8xf32>
    %75 = vector.extract_strided_slice %28 {offsets = [0, 16], sizes = [8, 8], strides = [1, 1]} : vector<8x32xf32> to vector<8x8xf32>
    %cst_29 = arith.constant dense<0.000000e+00> : vector<8x8xf32>
    %76 = tpu.matmul %74, %75, %cst_29 {dimension_numbers = #tpu.dot_dimension_numbers<[1], [1], [0], [0], [0, 0, 1, 0], [], []>} : vector<8x8xf32>, vector<8x8xf32>, vector<8x8xf32> -> vector<8x8xf32>
    %cst_30 = arith.constant 0.353553385 : f32
    %77 = vector.broadcast %cst_30 : f32 to vector<8x8xf32>
    %78 = arith.mulf %76, %77 : vector<8x8xf32>
    %79 = vector.broadcast %30 : vector<1x8xf32> to vector<8x8xf32>
    %80 = arith.addf %78, %79 : vector<8x8xf32>
    %cst_31 = arith.constant dense<0xFF800000> : vector<8xf32>
    %81 = vector.multi_reduction <maximumf>, %80, %cst_31 [1] : vector<8x8xf32> to vector<8xf32>
    %82 = vector.shape_cast %81 : vector<8xf32> to vector<8x1xf32>
    %83 = vector.broadcast %82 : vector<8x1xf32> to vector<8x8xf32>
    %84 = arith.subf %80, %83 : vector<8x8xf32>
    %85 = math.exp %84 : vector<8x8xf32>
    %cst_32 = arith.constant dense<0.000000e+00> : vector<8xf32>
    %86 = vector.multi_reduction <add>, %85, %cst_32 [1] : vector<8x8xf32> to vector<8xf32>
    %87 = vector.shape_cast %86 : vector<8xf32> to vector<8x1xf32>
    %88 = tpu.reciprocal %87 {approx = true} : vector<8x1xf32> -> vector<8x1xf32>
    %89 = vector.broadcast %88 : vector<8x1xf32> to vector<8x8xf32>
    %90 = arith.mulf %85, %89 : vector<8x8xf32>
    %91 = vector.extract_strided_slice %29 {offsets = [0, 16], sizes = [8, 8], strides = [1, 1]} : vector<8x32xf32> to vector<8x8xf32>
    %cst_33 = arith.constant dense<0.000000e+00> : vector<8x8xf32>
    %92 = tpu.matmul %90, %91, %cst_33 {dimension_numbers = #tpu.dot_dimension_numbers<[1], [0], [0], [1], [0, 0, 1, 1], [], []>} : vector<8x8xf32>, vector<8x8xf32>, vector<8x8xf32> -> vector<8x8xf32>
    %93 = vector.extract_strided_slice %26 {offsets = [16, 0], sizes = [8, 32], strides = [1, 1]} : vector<32x32xf32> to vector<8x32xf32>
    %cst_34 = arith.constant dense<0.000000e+00> : vector<8x32xf32>
    %94 = tpu.matmul %92, %93, %cst_34 {dimension_numbers = #tpu.dot_dimension_numbers<[1], [0], [0], [1], [0, 0, 1, 1], [], []>} : vector<8x8xf32>, vector<8x32xf32>, vector<8x32xf32> -> vector<8x32xf32>
    %95 = arith.addf %73, %94 : vector<8x32xf32>
    %96 = vector.extract_strided_slice %27 {offsets = [0, 24], sizes = [8, 8], strides = [1, 1]} : vector<8x32xf32> to vector<8x8xf32>
    %97 = vector.extract_strided_slice %28 {offsets = [0, 24], sizes = [8, 8], strides = [1, 1]} : vector<8x32xf32> to vector<8x8xf32>
    %cst_35 = arith.constant dense<0.000000e+00> : vector<8x8xf32>
    %98 = tpu.matmul %96, %97, %cst_35 {dimension_numbers = #tpu.dot_dimension_numbers<[1], [1], [0], [0], [0, 0, 1, 0], [], []>} : vector<8x8xf32>, vector<8x8xf32>, vector<8x8xf32> -> vector<8x8xf32>
    %cst_36 = arith.constant 0.353553385 : f32
    %99 = vector.broadcast %cst_36 : f32 to vector<8x8xf32>
    %100 = arith.mulf %98, %99 : vector<8x8xf32>
    %101 = vector.broadcast %30 : vector<1x8xf32> to vector<8x8xf32>
    %102 = arith.addf %100, %101 : vector<8x8xf32>
    %cst_37 = arith.constant dense<0xFF800000> : vector<8xf32>
    %103 = vector.multi_reduction <maximumf>, %102, %cst_37 [1] : vector<8x8xf32> to vector<8xf32>
    %104 = vector.shape_cast %103 : vector<8xf32> to vector<8x1xf32>
    %105 = vector.broadcast %104 : vector<8x1xf32> to vector<8x8xf32>
    %106 = arith.subf %102, %105 : vector<8x8xf32>
    %107 = math.exp %106 : vector<8x8xf32>
    %cst_38 = arith.constant dense<0.000000e+00> : vector<8xf32>
    %108 = vector.multi_reduction <add>, %107, %cst_38 [1] : vector<8x8xf32> to vector<8xf32>
    %109 = vector.shape_cast %108 : vector<8xf32> to vector<8x1xf32>
    %110 = tpu.reciprocal %109 {approx = true} : vector<8x1xf32> -> vector<8x1xf32>
    %111 = vector.broadcast %110 : vector<8x1xf32> to vector<8x8xf32>
    %112 = arith.mulf %107, %111 : vector<8x8xf32>
    %113 = vector.extract_strided_slice %29 {offsets = [0, 24], sizes = [8, 8], strides = [1, 1]} : vector<8x32xf32> to vector<8x8xf32>
    %cst_39 = arith.constant dense<0.000000e+00> : vector<8x8xf32>
    %114 = tpu.matmul %112, %113, %cst_39 {dimension_numbers = #tpu.dot_dimension_numbers<[1], [0], [0], [1], [0, 0, 1, 1], [], []>} : vector<8x8xf32>, vector<8x8xf32>, vector<8x8xf32> -> vector<8x8xf32>
    %115 = vector.extract_strided_slice %26 {offsets = [24, 0], sizes = [8, 32], strides = [1, 1]} : vector<32x32xf32> to vector<8x32xf32>
    %cst_40 = arith.constant dense<0.000000e+00> : vector<8x32xf32>
    %116 = tpu.matmul %114, %115, %cst_40 {dimension_numbers = #tpu.dot_dimension_numbers<[1], [0], [0], [1], [0, 0, 1, 1], [], []>} : vector<8x8xf32>, vector<8x32xf32>, vector<8x32xf32> -> vector<8x32xf32>
    %117 = arith.addf %95, %116 : vector<8x32xf32>
    %118 = vector.extract_strided_slice %23 {offsets = [8, 0], sizes = [8, 32], strides = [1, 1]} : vector<16x32xf32> to vector<8x32xf32>
    %119 = vector.extract_strided_slice %24 {offsets = [8, 0], sizes = [8, 32], strides = [1, 1]} : vector<16x32xf32> to vector<8x32xf32>
    %120 = vector.extract_strided_slice %22 {offsets = [8, 0], sizes = [8, 32], strides = [1, 1]} : vector<16x32xf32> to vector<8x32xf32>
    %121 = vector.extract_strided_slice %7 {offsets = [1, 0], sizes = [1, 8], strides = [1, 1]} : vector<2x8xf32> to vector<1x8xf32>
    %122 = vector.extract_strided_slice %118 {offsets = [0, 0], sizes = [8, 8], strides = [1, 1]} : vector<8x32xf32> to vector<8x8xf32>
    %123 = vector.extract_strided_slice %119 {offsets = [0, 0], sizes = [8, 8], strides = [1, 1]} : vector<8x32xf32> to vector<8x8xf32>
    %cst_41 = arith.constant dense<0.000000e+00> : vector<8x8xf32>
    %124 = tpu.matmul %122, %123, %cst_41 {dimension_numbers = #tpu.dot_dimension_numbers<[1], [1], [0], [0], [0, 0, 1, 0], [], []>} : vector<8x8xf32>, vector<8x8xf32>, vector<8x8xf32> -> vector<8x8xf32>
    %cst_42 = arith.constant 0.353553385 : f32
    %125 = vector.broadcast %cst_42 : f32 to vector<8x8xf32>
    %126 = arith.mulf %124, %125 : vector<8x8xf32>
    %127 = vector.broadcast %121 : vector<1x8xf32> to vector<8x8xf32>
    %128 = arith.addf %126, %127 : vector<8x8xf32>
    %cst_43 = arith.constant dense<0xFF800000> : vector<8xf32>
    %129 = vector.multi_reduction <maximumf>, %128, %cst_43 [1] : vector<8x8xf32> to vector<8xf32>
    %130 = vector.shape_cast %129 : vector<8xf32> to vector<8x1xf32>
    %131 = vector.broadcast %130 : vector<8x1xf32> to vector<8x8xf32>
    %132 = arith.subf %128, %131 : vector<8x8xf32>
    %133 = math.exp %132 : vector<8x8xf32>
    %cst_44 = arith.constant dense<0.000000e+00> : vector<8xf32>
    %134 = vector.multi_reduction <add>, %133, %cst_44 [1] : vector<8x8xf32> to vector<8xf32>
    %135 = vector.shape_cast %134 : vector<8xf32> to vector<8x1xf32>
    %136 = tpu.reciprocal %135 {approx = true} : vector<8x1xf32> -> vector<8x1xf32>
    %137 = vector.broadcast %136 : vector<8x1xf32> to vector<8x8xf32>
    %138 = arith.mulf %133, %137 : vector<8x8xf32>
    %139 = vector.extract_strided_slice %120 {offsets = [0, 0], sizes = [8, 8], strides = [1, 1]} : vector<8x32xf32> to vector<8x8xf32>
    %cst_45 = arith.constant dense<0.000000e+00> : vector<8x8xf32>
    %140 = tpu.matmul %138, %139, %cst_45 {dimension_numbers = #tpu.dot_dimension_numbers<[1], [0], [0], [1], [0, 0, 1, 1], [], []>} : vector<8x8xf32>, vector<8x8xf32>, vector<8x8xf32> -> vector<8x8xf32>
    %141 = vector.extract_strided_slice %26 {offsets = [0, 0], sizes = [8, 32], strides = [1, 1]} : vector<32x32xf32> to vector<8x32xf32>
    %cst_46 = arith.constant dense<0.000000e+00> : vector<8x32xf32>
    %142 = tpu.matmul %140, %141, %cst_46 {dimension_numbers = #tpu.dot_dimension_numbers<[1], [0], [0], [1], [0, 0, 1, 1], [], []>} : vector<8x8xf32>, vector<8x32xf32>, vector<8x32xf32> -> vector<8x32xf32>
    %143 = vector.extract_strided_slice %118 {offsets = [0, 8], sizes = [8, 8], strides = [1, 1]} : vector<8x32xf32> to vector<8x8xf32>
    %144 = vector.extract_strided_slice %119 {offsets = [0, 8], sizes = [8, 8], strides = [1, 1]} : vector<8x32xf32> to vector<8x8xf32>
    %cst_47 = arith.constant dense<0.000000e+00> : vector<8x8xf32>
    %145 = tpu.matmul %143, %144, %cst_47 {dimension_numbers = #tpu.dot_dimension_numbers<[1], [1], [0], [0], [0, 0, 1, 0], [], []>} : vector<8x8xf32>, vector<8x8xf32>, vector<8x8xf32> -> vector<8x8xf32>
    %cst_48 = arith.constant 0.353553385 : f32
    %146 = vector.broadcast %cst_48 : f32 to vector<8x8xf32>
    %147 = arith.mulf %145, %146 : vector<8x8xf32>
    %148 = vector.broadcast %121 : vector<1x8xf32> to vector<8x8xf32>
    %149 = arith.addf %147, %148 : vector<8x8xf32>
    %cst_49 = arith.constant dense<0xFF800000> : vector<8xf32>
    %150 = vector.multi_reduction <maximumf>, %149, %cst_49 [1] : vector<8x8xf32> to vector<8xf32>
    %151 = vector.shape_cast %150 : vector<8xf32> to vector<8x1xf32>
    %152 = vector.broadcast %151 : vector<8x1xf32> to vector<8x8xf32>
    %153 = arith.subf %149, %152 : vector<8x8xf32>
    %154 = math.exp %153 : vector<8x8xf32>
    %cst_50 = arith.constant dense<0.000000e+00> : vector<8xf32>
    %155 = vector.multi_reduction <add>, %154, %cst_50 [1] : vector<8x8xf32> to vector<8xf32>
    %156 = vector.shape_cast %155 : vector<8xf32> to vector<8x1xf32>
    %157 = tpu.reciprocal %156 {approx = true} : vector<8x1xf32> -> vector<8x1xf32>
    %158 = vector.broadcast %157 : vector<8x1xf32> to vector<8x8xf32>
    %159 = arith.mulf %154, %158 : vector<8x8xf32>
    %160 = vector.extract_strided_slice %120 {offsets = [0, 8], sizes = [8, 8], strides = [1, 1]} : vector<8x32xf32> to vector<8x8xf32>
    %cst_51 = arith.constant dense<0.000000e+00> : vector<8x8xf32>
    %161 = tpu.matmul %159, %160, %cst_51 {dimension_numbers = #tpu.dot_dimension_numbers<[1], [0], [0], [1], [0, 0, 1, 1], [], []>} : vector<8x8xf32>, vector<8x8xf32>, vector<8x8xf32> -> vector<8x8xf32>
    %162 = vector.extract_strided_slice %26 {offsets = [8, 0], sizes = [8, 32], strides = [1, 1]} : vector<32x32xf32> to vector<8x32xf32>
    %cst_52 = arith.constant dense<0.000000e+00> : vector<8x32xf32>
    %163 = tpu.matmul %161, %162, %cst_52 {dimension_numbers = #tpu.dot_dimension_numbers<[1], [0], [0], [1], [0, 0, 1, 1], [], []>} : vector<8x8xf32>, vector<8x32xf32>, vector<8x32xf32> -> vector<8x32xf32>
    %164 = arith.addf %142, %163 : vector<8x32xf32>
    %165 = vector.extract_strided_slice %118 {offsets = [0, 16], sizes = [8, 8], strides = [1, 1]} : vector<8x32xf32> to vector<8x8xf32>
    %166 = vector.extract_strided_slice %119 {offsets = [0, 16], sizes = [8, 8], strides = [1, 1]} : vector<8x32xf32> to vector<8x8xf32>
    %cst_53 = arith.constant dense<0.000000e+00> : vector<8x8xf32>
    %167 = tpu.matmul %165, %166, %cst_53 {dimension_numbers = #tpu.dot_dimension_numbers<[1], [1], [0], [0], [0, 0, 1, 0], [], []>} : vector<8x8xf32>, vector<8x8xf32>, vector<8x8xf32> -> vector<8x8xf32>
    %cst_54 = arith.constant 0.353553385 : f32
    %168 = vector.broadcast %cst_54 : f32 to vector<8x8xf32>
    %169 = arith.mulf %167, %168 : vector<8x8xf32>
    %170 = vector.broadcast %121 : vector<1x8xf32> to vector<8x8xf32>
    %171 = arith.addf %169, %170 : vector<8x8xf32>
    %cst_55 = arith.constant dense<0xFF800000> : vector<8xf32>
    %172 = vector.multi_reduction <maximumf>, %171, %cst_55 [1] : vector<8x8xf32> to vector<8xf32>
    %173 = vector.shape_cast %172 : vector<8xf32> to vector<8x1xf32>
    %174 = vector.broadcast %173 : vector<8x1xf32> to vector<8x8xf32>
    %175 = arith.subf %171, %174 : vector<8x8xf32>
    %176 = math.exp %175 : vector<8x8xf32>
    %cst_56 = arith.constant dense<0.000000e+00> : vector<8xf32>
    %177 = vector.multi_reduction <add>, %176, %cst_56 [1] : vector<8x8xf32> to vector<8xf32>
    %178 = vector.shape_cast %177 : vector<8xf32> to vector<8x1xf32>
    %179 = tpu.reciprocal %178 {approx = true} : vector<8x1xf32> -> vector<8x1xf32>
    %180 = vector.broadcast %179 : vector<8x1xf32> to vector<8x8xf32>
    %181 = arith.mulf %176, %180 : vector<8x8xf32>
    %182 = vector.extract_strided_slice %120 {offsets = [0, 16], sizes = [8, 8], strides = [1, 1]} : vector<8x32xf32> to vector<8x8xf32>
    %cst_57 = arith.constant dense<0.000000e+00> : vector<8x8xf32>
    %183 = tpu.matmul %181, %182, %cst_57 {dimension_numbers = #tpu.dot_dimension_numbers<[1], [0], [0], [1], [0, 0, 1, 1], [], []>} : vector<8x8xf32>, vector<8x8xf32>, vector<8x8xf32> -> vector<8x8xf32>
    %184 = vector.extract_strided_slice %26 {offsets = [16, 0], sizes = [8, 32], strides = [1, 1]} : vector<32x32xf32> to vector<8x32xf32>
    %cst_58 = arith.constant dense<0.000000e+00> : vector<8x32xf32>
    %185 = tpu.matmul %183, %184, %cst_58 {dimension_numbers = #tpu.dot_dimension_numbers<[1], [0], [0], [1], [0, 0, 1, 1], [], []>} : vector<8x8xf32>, vector<8x32xf32>, vector<8x32xf32> -> vector<8x32xf32>
    %186 = arith.addf %164, %185 : vector<8x32xf32>
    %187 = vector.extract_strided_slice %118 {offsets = [0, 24], sizes = [8, 8], strides = [1, 1]} : vector<8x32xf32> to vector<8x8xf32>
    %188 = vector.extract_strided_slice %119 {offsets = [0, 24], sizes = [8, 8], strides = [1, 1]} : vector<8x32xf32> to vector<8x8xf32>
    %cst_59 = arith.constant dense<0.000000e+00> : vector<8x8xf32>
    %189 = tpu.matmul %187, %188, %cst_59 {dimension_numbers = #tpu.dot_dimension_numbers<[1], [1], [0], [0], [0, 0, 1, 0], [], []>} : vector<8x8xf32>, vector<8x8xf32>, vector<8x8xf32> -> vector<8x8xf32>
    %cst_60 = arith.constant 0.353553385 : f32
    %190 = vector.broadcast %cst_60 : f32 to vector<8x8xf32>
    %191 = arith.mulf %189, %190 : vector<8x8xf32>
    %192 = vector.broadcast %121 : vector<1x8xf32> to vector<8x8xf32>
    %193 = arith.addf %191, %192 : vector<8x8xf32>
    %cst_61 = arith.constant dense<0xFF800000> : vector<8xf32>
    %194 = vector.multi_reduction <maximumf>, %193, %cst_61 [1] : vector<8x8xf32> to vector<8xf32>
    %195 = vector.shape_cast %194 : vector<8xf32> to vector<8x1xf32>
    %196 = vector.broadcast %195 : vector<8x1xf32> to vector<8x8xf32>
    %197 = arith.subf %193, %196 : vector<8x8xf32>
    %198 = math.exp %197 : vector<8x8xf32>
    %cst_62 = arith.constant dense<0.000000e+00> : vector<8xf32>
    %199 = vector.multi_reduction <add>, %198, %cst_62 [1] : vector<8x8xf32> to vector<8xf32>
    %200 = vector.shape_cast %199 : vector<8xf32> to vector<8x1xf32>
    %201 = tpu.reciprocal %200 {approx = true} : vector<8x1xf32> -> vector<8x1xf32>
    %202 = vector.broadcast %201 : vector<8x1xf32> to vector<8x8xf32>
    %203 = arith.mulf %198, %202 : vector<8x8xf32>
    %204 = vector.extract_strided_slice %120 {offsets = [0, 24], sizes = [8, 8], strides = [1, 1]} : vector<8x32xf32> to vector<8x8xf32>
    %cst_63 = arith.constant dense<0.000000e+00> : vector<8x8xf32>
    %205 = tpu.matmul %203, %204, %cst_63 {dimension_numbers = #tpu.dot_dimension_numbers<[1], [0], [0], [1], [0, 0, 1, 1], [], []>} : vector<8x8xf32>, vector<8x8xf32>, vector<8x8xf32> -> vector<8x8xf32>
    %206 = vector.extract_strided_slice %26 {offsets = [24, 0], sizes = [8, 32], strides = [1, 1]} : vector<32x32xf32> to vector<8x32xf32>
    %cst_64 = arith.constant dense<0.000000e+00> : vector<8x32xf32>
    %207 = tpu.matmul %205, %206, %cst_64 {dimension_numbers = #tpu.dot_dimension_numbers<[1], [0], [0], [1], [0, 0, 1, 1], [], []>} : vector<8x8xf32>, vector<8x32xf32>, vector<8x32xf32> -> vector<8x32xf32>
    %208 = arith.addf %186, %207 : vector<8x32xf32>
    %209 = tpu.concatenate %117, %208 in 0 : vector<8x32xf32>, vector<8x32xf32> -> vector<16x32xf32>
    %c0_65 = arith.constant 0 : index
    %c0_66 = arith.constant 0 : index
    %c0_67 = arith.constant 0 : index
    %210 = vector.load %arg7[%c0_65, %c0_66, %c0_67] : memref<1x1x32xf32, #tpu.memory_space<vmem>>, vector<1x1x32xf32>
    %211 = vector.shape_cast %210 : vector<1x1x32xf32> to vector<1x32xf32>
    %212 = vector.broadcast %211 : vector<1x32xf32> to vector<16x32xf32>
    %213 = arith.addf %209, %212 : vector<16x32xf32>
    %214 = arith.addf %3, %213 : vector<16x32xf32>
    %cst_68 = arith.constant dense<0.000000e+00> : vector<16xf32>
    %215 = vector.multi_reduction <add>, %214, %cst_68 [1] : vector<16x32xf32> to vector<16xf32>
    %216 = vector.shape_cast %215 : vector<16xf32> to vector<16x1xf32>
    %cst_69 = arith.constant 3.200000e+01 : f32
    %217 = vector.broadcast %cst_69 : f32 to vector<16x1xf32>
    %218 = arith.divf %216, %217 : vector<16x1xf32>
    %219 = vector.broadcast %218 : vector<16x1xf32> to vector<16x32xf32>
    %220 = arith.subf %214, %219 : vector<16x32xf32>
    %221 = arith.mulf %220, %220 : vector<16x32xf32>
    %cst_70 = arith.constant dense<0.000000e+00> : vector<16xf32>
    %222 = vector.multi_reduction <add>, %221, %cst_70 [1] : vector<16x32xf32> to vector<16xf32>
    %223 = vector.shape_cast %222 : vector<16xf32> to vector<16x1xf32>
    %cst_71 = arith.constant 3.200000e+01 : f32
    %224 = vector.broadcast %cst_71 : f32 to vector<16x1xf32>
    %225 = arith.divf %223, %224 : vector<16x1xf32>
    %226 = vector.broadcast %218 : vector<16x1xf32> to vector<16x32xf32>
    %227 = arith.subf %214, %226 : vector<16x32xf32>
    %cst_72 = arith.constant 9.99999974E-6 : f32
    %228 = vector.broadcast %cst_72 : f32 to vector<16x1xf32>
    %229 = arith.addf %225, %228 : vector<16x1xf32>
    %230 = math.rsqrt %229 : vector<16x1xf32>
    %231 = vector.broadcast %230 : vector<16x1xf32> to vector<16x32xf32>
    %232 = arith.mulf %227, %231 : vector<16x32xf32>
    %c0_73 = arith.constant 0 : index
    %c0_74 = arith.constant 0 : index
    %c0_75 = arith.constant 0 : index
    %233 = vector.load %arg12[%c0_73, %c0_74, %c0_75] : memref<1x1x32xf32, #tpu.memory_space<vmem>>, vector<1x1x32xf32>
    %234 = vector.shape_cast %233 : vector<1x1x32xf32> to vector<1x32xf32>
    %235 = vector.broadcast %234 : vector<1x32xf32> to vector<16x32xf32>
    %236 = arith.mulf %232, %235 : vector<16x32xf32>
    %c0_76 = arith.constant 0 : index
    %c0_77 = arith.constant 0 : index
    %c0_78 = arith.constant 0 : index
    %237 = vector.load %arg13[%c0_76, %c0_77, %c0_78] : memref<1x1x32xf32, #tpu.memory_space<vmem>>, vector<1x1x32xf32>
    %238 = vector.shape_cast %237 : vector<1x1x32xf32> to vector<1x32xf32>
    %239 = vector.broadcast %238 : vector<1x32xf32> to vector<16x32xf32>
    %240 = arith.addf %236, %239 : vector<16x32xf32>
    %c0_79 = arith.constant 0 : index
    %c0_80 = arith.constant 0 : index
    %c0_81 = arith.constant 0 : index
    %241 = vector.load %arg8[%c0_79, %c0_80, %c0_81] : memref<1x32x64xf32, #tpu.memory_space<vmem>>, vector<1x32x64xf32>
    %242 = vector.shape_cast %241 : vector<1x32x64xf32> to vector<32x64xf32>
    %cst_82 = arith.constant dense<0.000000e+00> : vector<16x64xf32>
    %243 = tpu.matmul %240, %242, %cst_82 {dimension_numbers = #tpu.dot_dimension_numbers<[1], [0], [0], [1], [0, 0, 1, 1], [], []>} : vector<16x32xf32>, vector<32x64xf32>, vector<16x64xf32> -> vector<16x64xf32>
    %c0_83 = arith.constant 0 : index
    %c0_84 = arith.constant 0 : index
    %c0_85 = arith.constant 0 : index
    %244 = vector.load %arg9[%c0_83, %c0_84, %c0_85] : memref<1x1x64xf32, #tpu.memory_space<vmem>>, vector<1x1x64xf32>
    %245 = vector.shape_cast %244 : vector<1x1x64xf32> to vector<1x64xf32>
    %246 = vector.broadcast %245 : vector<1x64xf32> to vector<16x64xf32>
    %247 = arith.addf %243, %246 : vector<16x64xf32>
    %cst_86 = arith.constant 0.000000e+00 : f32
    %248 = vector.broadcast %cst_86 : f32 to vector<16x64xf32>
    %249 = arith.maximumf %247, %248 : vector<16x64xf32>
    %c0_87 = arith.constant 0 : index
    %c0_88 = arith.constant 0 : index
    %c0_89 = arith.constant 0 : index
    %250 = vector.load %arg10[%c0_87, %c0_88, %c0_89] : memref<1x64x32xf32, #tpu.memory_space<vmem>>, vector<1x64x32xf32>
    %251 = vector.shape_cast %250 : vector<1x64x32xf32> to vector<64x32xf32>
    %cst_90 = arith.constant dense<0.000000e+00> : vector<16x32xf32>
    %252 = tpu.matmul %249, %251, %cst_90 {dimension_numbers = #tpu.dot_dimension_numbers<[1], [0], [0], [1], [0, 0, 1, 1], [], []>} : vector<16x64xf32>, vector<64x32xf32>, vector<16x32xf32> -> vector<16x32xf32>
    %c0_91 = arith.constant 0 : index
    %c0_92 = arith.constant 0 : index
    %c0_93 = arith.constant 0 : index
    %253 = vector.load %arg11[%c0_91, %c0_92, %c0_93] : memref<1x1x32xf32, #tpu.memory_space<vmem>>, vector<1x1x32xf32>
    %254 = vector.shape_cast %253 : vector<1x1x32xf32> to vector<1x32xf32>
    %255 = vector.broadcast %254 : vector<1x32xf32> to vector<16x32xf32>
    %256 = arith.addf %252, %255 : vector<16x32xf32>
    %257 = arith.addf %240, %256 : vector<16x32xf32>
    %cst_94 = arith.constant dense<0.000000e+00> : vector<16xf32>
    %258 = vector.multi_reduction <add>, %257, %cst_94 [1] : vector<16x32xf32> to vector<16xf32>
    %259 = vector.shape_cast %258 : vector<16xf32> to vector<16x1xf32>
    %cst_95 = arith.constant 3.200000e+01 : f32
    %260 = vector.broadcast %cst_95 : f32 to vector<16x1xf32>
    %261 = arith.divf %259, %260 : vector<16x1xf32>
    %262 = vector.broadcast %261 : vector<16x1xf32> to vector<16x32xf32>
    %263 = arith.subf %257, %262 : vector<16x32xf32>
    %264 = arith.mulf %263, %263 : vector<16x32xf32>
    %cst_96 = arith.constant dense<0.000000e+00> : vector<16xf32>
    %265 = vector.multi_reduction <add>, %264, %cst_96 [1] : vector<16x32xf32> to vector<16xf32>
    %266 = vector.shape_cast %265 : vector<16xf32> to vector<16x1xf32>
    %cst_97 = arith.constant 3.200000e+01 : f32
    %267 = vector.broadcast %cst_97 : f32 to vector<16x1xf32>
    %268 = arith.divf %266, %267 : vector<16x1xf32>
    %269 = vector.broadcast %261 : vector<16x1xf32> to vector<16x32xf32>
    %270 = arith.subf %257, %269 : vector<16x32xf32>
    %cst_98 = arith.constant 9.99999974E-6 : f32
    %271 = vector.broadcast %cst_98 : f32 to vector<16x1xf32>
    %272 = arith.addf %268, %271 : vector<16x1xf32>
    %273 = math.rsqrt %272 : vector<16x1xf32>
    %274 = vector.broadcast %273 : vector<16x1xf32> to vector<16x32xf32>
    %275 = arith.mulf %270, %274 : vector<16x32xf32>
    %c0_99 = arith.constant 0 : index
    %c0_100 = arith.constant 0 : index
    %c0_101 = arith.constant 0 : index
    %276 = vector.load %arg14[%c0_99, %c0_100, %c0_101] : memref<1x1x32xf32, #tpu.memory_space<vmem>>, vector<1x1x32xf32>
    %277 = vector.shape_cast %276 : vector<1x1x32xf32> to vector<1x32xf32>
    %278 = vector.broadcast %277 : vector<1x32xf32> to vector<16x32xf32>
    %279 = arith.mulf %275, %278 : vector<16x32xf32>
    %c0_102 = arith.constant 0 : index
    %c0_103 = arith.constant 0 : index
    %c0_104 = arith.constant 0 : index
    %280 = vector.load %arg15[%c0_102, %c0_103, %c0_104] : memref<1x1x32xf32, #tpu.memory_space<vmem>>, vector<1x1x32xf32>
    %281 = vector.shape_cast %280 : vector<1x1x32xf32> to vector<1x32xf32>
    %282 = vector.broadcast %281 : vector<1x32xf32> to vector<16x32xf32>
    %283 = arith.addf %279, %282 : vector<16x32xf32>
    %c0_105 = arith.constant 0 : index
    %c0_106 = arith.constant 0 : index
    %284 = vector.load %arg18[%c0_105, %c0_106] : memref<16x32xf32, #tpu.memory_space<vmem>>, vector<16x32xf32>
    tpu.vector_store %arg18[%c0_105, %c0_106], %283 {strides = array<i32>} : memref<16x32xf32, #tpu.memory_space<vmem>>, vector<16x32xf32>,
    return
  }
  func.func @transform_0(%arg0: i32) -> (i32, i32) {
    %c0_i32 = arith.constant 0 : i32
    %c0_i32_0 = arith.constant 0 : i32
    %c0_i32_1 = arith.constant 0 : i32
    return %c0_i32, %c0_i32_0 : i32, i32
  }
  func.func @transform_1(%arg0: i32) -> (i32, i32) {
    %c0_i32 = arith.constant 0 : i32
    %c0_i32_0 = arith.constant 0 : i32
    %c0_i32_1 = arith.constant 0 : i32
    return %c0_i32, %c0_i32_0 : i32, i32
  }
  func.func @transform_2(%arg0: i32) -> (i32, i32) {
    %c0_i32 = arith.constant 0 : i32
    %c0_i32_0 = arith.constant 0 : i32
    %c0_i32_1 = arith.constant 0 : i32
    return %c0_i32, %c0_i32_0 : i32, i32
  }
  func.func @transform_3(%arg0: i32) -> (i32, i32, i32) {
    %c0_i32 = arith.constant 0 : i32
    %c0_i32_0 = arith.constant 0 : i32
    %c0_i32_1 = arith.constant 0 : i32
    return %arg0, %c0_i32, %c0_i32_0 : i32, i32, i32
  }
  func.func @transform_4(%arg0: i32) -> (i32, i32, i32) {
    %c0_i32 = arith.constant 0 : i32
    %c0_i32_0 = arith.constant 0 : i32
    %c0_i32_1 = arith.constant 0 : i32
    return %arg0, %c0_i32, %c0_i32_0 : i32, i32, i32
  }
  func.func @transform_5(%arg0: i32) -> (i32, i32, i32) {
    %c0_i32 = arith.constant 0 : i32
    %c0_i32_0 = arith.constant 0 : i32
    %c0_i32_1 = arith.constant 0 : i32
    return %arg0, %c0_i32, %c0_i32_0 : i32, i32, i32
  }
  func.func @transform_6(%arg0: i32) -> (i32, i32, i32) {
    %c0_i32 = arith.constant 0 : i32
    %c0_i32_0 = arith.constant 0 : i32
    %c0_i32_1 = arith.constant 0 : i32
    return %arg0, %c0_i32, %c0_i32_0 : i32, i32, i32
  }
  func.func @transform_7(%arg0: i32) -> (i32, i32, i32) {
    %c0_i32 = arith.constant 0 : i32
    %c0_i32_0 = arith.constant 0 : i32
    %c0_i32_1 = arith.constant 0 : i32
    return %arg0, %c0_i32, %c0_i32_0 : i32, i32, i32
  }
  func.func @transform_8(%arg0: i32) -> (i32, i32, i32) {
    %c0_i32 = arith.constant 0 : i32
    %c0_i32_0 = arith.constant 0 : i32
    %c0_i32_1 = arith.constant 0 : i32
    return %arg0, %c0_i32, %c0_i32_0 : i32, i32, i32
  }
  func.func @transform_9(%arg0: i32) -> (i32, i32, i32) {
    %c0_i32 = arith.constant 0 : i32
    %c0_i32_0 = arith.constant 0 : i32
    %c0_i32_1 = arith.constant 0 : i32
    return %arg0, %c0_i32, %c0_i32_0 : i32, i32, i32
  }
  func.func @transform_10(%arg0: i32) -> (i32, i32, i32) {
    %c0_i32 = arith.constant 0 : i32
    %c0_i32_0 = arith.constant 0 : i32
    %c0_i32_1 = arith.constant 0 : i32
    return %arg0, %c0_i32, %c0_i32_0 : i32, i32, i32
  }
  func.func @transform_11(%arg0: i32) -> (i32, i32, i32) {
    %c0_i32 = arith.constant 0 : i32
    %c0_i32_0 = arith.constant 0 : i32
    %c0_i32_1 = arith.constant 0 : i32
    return %arg0, %c0_i32, %c0_i32_0 : i32, i32, i32
  }
  func.func @transform_12(%arg0: i32) -> (i32, i32, i32) {
    %c0_i32 = arith.constant 0 : i32
    %c0_i32_0 = arith.constant 0 : i32
    %c0_i32_1 = arith.constant 0 : i32
    return %arg0, %c0_i32, %c0_i32_0 : i32, i32, i32
  }
  func.func @transform_13(%arg0: i32) -> (i32, i32, i32) {
    %c0_i32 = arith.constant 0 : i32
    %c0_i32_0 = arith.constant 0 : i32
    %c0_i32_1 = arith.constant 0 : i32
    return %arg0, %c0_i32, %c0_i32_0 : i32, i32, i32
  }
  func.func @transform_14(%arg0: i32) -> (i32, i32, i32) {
    %c0_i32 = arith.constant 0 : i32
    %c0_i32_0 = arith.constant 0 : i32
    %c0_i32_1 = arith.constant 0 : i32
    return %arg0, %c0_i32, %c0_i32_0 : i32, i32, i32
  }
  func.func @transform_15(%arg0: i32) -> (i32, i32) {
    %c0_i32 = arith.constant 0 : i32
    %c0_i32_0 = arith.constant 0 : i32
    %c0_i32_1 = arith.constant 0 : i32
    return %c0_i32, %c0_i32_0 : i32, i32
  }
  func.func @transform_16(%arg0: i32) -> (i32, i32) {
    %c0_i32 = arith.constant 0 : i32
    %c0_i32_0 = arith.constant 0 : i32
    %c0_i32_1 = arith.constant 0 : i32
    return %c0_i32, %c0_i32_0 : i32, i32
  }
  func.func @transform_17(%arg0: i32) -> (i32, i32) {
    %c0_i32 = arith.constant 0 : i32
    %c0_i32_0 = arith.constant 0 : i32
    %c0_i32_1 = arith.constant 0 : i32
    return %c0_i32, %c0_i32_0 : i32, i32
  }
}

</mosaic_0001>

<bundles_post_ra>
// kernel: act_encoder_forward.1
= control target key start
LH: loop header
LB: loop body
LE: loop exit
PB: predicated region body
PF: predicated region fallthrough
CT: control target
= control target key end

     0   :  { %s3759_s24 = smov 0   ;;  %s4189_s0 = inlined_call_operand.vmem [shape: f32[16,32], index: 0, kind: input, shape index: {}]   ;;  %s4190_s1 = inlined_call_operand.vmem [shape: f32[16,32], index: 1, kind: input, shape index: {}]   ;;  %s4191_s2 = inlined_call_operand.vmem [shape: f32[2,8], index: 2, kind: input, shape index: {}]   ;;  %s4192_s3 = inlined_call_operand.vmem [shape: f32[3,32,96], index: 3, kind: input, shape index: {}]   ;;  %s4193_s4 = inlined_call_operand.vmem [shape: f32[3,1,96], index: 4, kind: input, shape index: {}]   ;;  %s4194_s5 = inlined_call_operand.vmem [shape: f32[3,32,32], index: 5, kind: input, shape index: {}]   ;;  %s4195_s6 = inlined_call_operand.vmem [shape: f32[3,1,32], index: 6, kind: input, shape index: {}]   ;;  %s4196_s7 = inlined_call_operand.vmem [shape: f32[3,32,64], index: 7, kind: input, shape index: {}]   ;;  %s4197_s8 = inlined_call_operand.vmem [shape: f32[3,1,64], index: 8, kind: input, shape index: {}]   ;;  %s4198_s9 = inlined_call_operand.vmem [shape: f32[3,64,32], index: 9, kind: input, shape index: {}]   ;;  %s4199_s10 = inlined_call_operand.vmem [shape: f32[3,1,32], index: 10, kind: input, shape index: {}]   ;;  %s4200_s11 = inlined_call_operand.vmem [shape: f32[3,1,32], index: 11, kind: input, shape index: {}]   ;;  %s4201_s12 = inlined_call_operand.vmem [shape: f32[3,1,32], index: 12, kind: input, shape index: {}]   ;;  %s4202_s13 = inlined_call_operand.vmem [shape: f32[3,1,32], index: 13, kind: input, shape index: {}]   ;;  %s4203_s14 = inlined_call_operand.vmem [shape: f32[3,1,32], index: 14, kind: input, shape index: {}]   ;;  %s4204_s15 = inlined_call_operand.vmem [shape: f32[1,32], index: 15, kind: input, shape index: {}]   ;;  %s4205_s16 = inlined_call_operand.vmem [shape: f32[1,32], index: 16, kind: input, shape index: {}]   ;;  %s4206_s17 = inlined_call_operand.vmem [shape: f32[16,32], index: 17, kind: output, shape index: {}]  }
   0x1   :  { %4210 = sst [smem:[#allocation3_spill]] %s4189_s0 }
   0x2   :  { %4211 = sst [smem:[#allocation4_spill]] %s4190_s1 }
   0x3   :  { %4212 = sst [smem:[#allocation5_spill]] %s4191_s2 }
   0x4   :  { %4213 = sst [smem:[#allocation6_spill]] %s4192_s3 }
   0x5   :  { %4214 = sst [smem:[#allocation7_spill]] %s4194_s5 }
   0x6   :  { %4215 = sst [smem:[#allocation8_spill]] %s4196_s7 }
   0x7   :  { %4216 = sst [smem:[#allocation9_spill]] %s4197_s8 }
   0x8 LB: > { %4217 = sst [smem:[#allocation2_spill]] %s3657_s24  ;;  %s3278_s25 = sadd.s32 4294967295, %s3657_s24   ;;  %s3657_s24 = sphi %s3759_s24, %s27_s24  }
   0x9   : > { %p3281_p0 = scmp.ge.s32.totalorder %s3657_s24, 1  ;;  %p576_p1 = scmp.lt.s32.totalorder %s3657_s24, 4 }
   0xb   : > { %p577_p2 = pnand %p3281_p0, %p576_p1 }
   0xc   : > { %p662_p3 = scmp.lt.s32.totalorder (!%p577_p2), %s3278_s25, 2  ;;  %s4218_s3 = sld [smem:[#allocation6_spill]] (!%p577_p2) }
   0xd   : > { %580 = sbr.rel (%p577_p2) target bundleno = 5747 (0x1673), region = 88  ;;  %s4219_s5 = sld [smem:[#allocation7_spill]] (!%p577_p2) }
   0xe   : > { %s4220_s7 = sld [smem:[#allocation8_spill]] (!%p577_p2)  ;;  %p3290_p4 = scmp.ne.s32.totalorder (!%p577_p2), %s3278_s25, 0 }
  0x12   : > { %s3767_s15 = scalar_select %p662_p3, %s3278_s25, 2 }
  0x13   : > { %s4222_s19 = sld [smem:[#allocation3_spill]] (!%p3290_p4) }
  0x14   : > { %s3341_s16 = sshll.u32 %s3767_s15, 5  ;;  %s3344_s0 = sshll.u32 %s3767_s15, 6 }
  0x15   : > { %s3777_s30 = scalar_lea.vmem %s4218_s3, %s3341_s16  ;;  %s3782_s1 = scalar_lea.vmem %s4219_s5, %s3341_s16 }
  0x16   : > { %s3791_s2 = scalar_lea.vmem %s4220_s7, %s3341_s16  ;;  %s3801_s18 = scalar_lea.vmem %s4198_s9, %s3344_s0 }
  0x17   : > { %s693_s20 = scalar_lea.vmem %s4199_s10, %s3767_s15  ;;  %s696_s24 = scalar_lea.vmem %s4200_s11, %s3767_s15 }
  0x18   : > { %s699_s7 = scalar_lea.vmem %s4201_s12, %s3767_s15  ;;  %s702_s29 = scalar_lea.vmem %s4202_s13, %s3767_s15 }
  0x19   : > { %s705_s28 = scalar_lea.vmem %s4203_s14, %s3767_s15  ;;  %709 = sbr.rel (%p3290_p4) target bundleno = 32 (0x20), region = 92 }
  0x1e   : > { %v710_v0 = vld [vmem:[%s4222_s19] sm:$0xff]  ;;  %vm712_vm0 = vcmask 261120   ;;  %v711_v1 = vld [vmem:[%s4222_s19 + $0x8] sm:$0xff] }
  0x1f   : > { %713 = vst.msk [vmem:[%s4206_s17] sm:$0xff] %vm712_vm0, %v710_v0  ;;  %714 = vst.msk [vmem:[%s4206_s17 + $0x8] sm:$0xff] %vm712_vm0, %v711_v1 }
  0x20 PF: > { %v726_v2 = vld [vmem:[%s3777_s30 + $0x18] sm:$0xff]  ;;  %v725_v3 = vld [vmem:[%s3777_s30 + $0x10] sm:$0xff]  ;;  %s4223_s0 = sld [smem:[#allocation4_spill]]  ;;  %vm734_vm1 = vcmask 261120   ;;  %v724_v6 = vld [vmem:[%s3777_s30 + $0x8] sm:$0xff]  ;;  %v3659_v12 = vmov 0.0   ;;  %s4224_s8 = scalar_lea.vmem %s4193_s4, %s3767_s15  ;;  %v999_v22 = vlaneseq }
  0x21   : > { %3421 = vmatprep.subr.mxu0 %v726_v2  ;;  %v723_v10 = vld [vmem:[%s3777_s30] sm:$0xff]  ;;  %vm3660_vm2 = vmmov 0   ;;  %s3661_s26 = smov 64   ;;  %s3662_s25 = smov 96   ;;  %vm923_vm3 = vcmask 64512   ;;  %v3941_v60 = vld [vmem:[%s3782_s1 + $0x8] sm:$0xff] }
  0x22   : > { %3422 = vmatpush3.msra.mxu0 %v726_v2  ;;  %824 = vrot.lane.b32.xlu1 %v725_v3, %s3661_s26  ;;  %v3873_v14 = vld [vmem:[%s4224_s8] ss:$0 sm:$0xff]  ;;  %v3893_v23 = vshrl.u32 %v999_v22, 7  ;;  %s4225_s22 = sld [smem:[#allocation5_spill]]  ;;  %s3663_s21 = smov 88   ;;  %vm3012_vm4 = vcmask 523264  }
  0x23   : > { %3423 = vmatprep.subr.mxu0 %v725_v3  ;;  %s3664_s16 = smov 120   ;;  %s3665_s23 = smov 112   ;;  %v3946_v0 = vld [vmem:[%s3782_s1] sm:$0xff] }
  0x24   : > { %3424 = vmatpush3.msra.mxu0 %v725_v3  ;;  %v1001_v26 = vsub.s32 0, %v3893_v23  ;;  %s3667_s30 = smov 72   ;;  %s3668_s27 = smov 104  }
  0x25   : > { %3425 = vmatprep.subr.mxu0 %v724_v6 }
  0x26   : > { %v3840_v4 = vld [vmem:[%s4206_s17] sm:$0xff]  ;;  %v3850_v8 = vld [vmem:[%s4206_s17 + $0x8] sm:$0xff]  ;;  %3426 = vmatpush3.msra.mxu0 %v724_v6  ;;  %822 = vrot.lane.b32.xlu1 %v724_v6, %s3661_s26 }
  0x27   : > { %v717_v5 = vld [vmem:[%s4223_s0] sm:$0xff]  ;;  %v718_v9 = vld [vmem:[%s4223_s0 + $0x8] sm:$0xff]  ;;  %3440 = vmatprep.mubr.msk.f32.mxu1 %vm734_vm1, %v3840_v4  ;;  %3427 = vmatprep.subr.mxu0 %v723_v10 }
  0x28   : > { %v721_v7 = vadd.f32 %v717_v5, %v3840_v4  ;;  %v722_v11 = vadd.f32 %v718_v9, %v3850_v8  ;;  %3428 = vmatpush3.msra.mxu0 %v723_v10  ;;  %v719_v24 = vld [vmem:[%s4225_s22] sm:$0x3] }
  0x29   : > { %3443 = vmatprep.subr.mxu0 %v3659_v12  ;;  %v3898_v25 = vmul.f32 -1e+30, %v719_v24 }
  0x2a   : > { %3429 = vmatprep.mubr.msk.f32.mxu0 %vm734_vm1, %v721_v7 }
  0x2b   : > { %3430 = vmatmul.mubr.msk.f32.vlgmr.msra.gmra.mxu0 %vm734_vm1, %v722_v11  ;;  %v3902_v27 = vrot.slane %v3898_v25, %v1001_v26 }
  0x2c   : > { %3445 = vmatprep.mubr.msk.f32.mxu0 %vm3660_vm2, %v3659_v12 }
  0x94   : > { %v825_v19 = vpop.permute.xlu1 %824 }
  0x98   : > { %v823_v20 = vpop.permute.xlu1 %822 }
  0xeb   : > { %v3865_v13 = vpop.f32.mrf.mxu0 }
  0xed   : > { %v807_v15 = vpop.f32.mrf.mxu0 }
  0xee   : > { %v3876_v16 = vadd.f32 %v3873_v14, %v807_v15 }
  0xf0   : > { %921 = vrot.lane.b32.xlu0 %v3876_v16, %s3662_s25 }
  0xf4   : > { %826 = vrot.lane.b32.xlu0 %v726_v2, %s3661_s26 }
  0xf8   : > { %820 = vrot.lane.b32.xlu0 %v723_v10, %s3661_s26 }
 0x162   : > { %v922_v17 = vpop.permute.xlu0 %921 }
 0x163   : > { %3444 = vmatpush3.xpose.msk.msra.mxu0 %vm923_vm3, %v922_v17 }
 0x164   : > { %3448 = vmatprep.subr.mxu0 %v3659_v12 }
 0x166   : > { %3446 = vmatmul.mubr.msk.f32.vlgmr.msra.gmra.mxu0 %vm923_vm3, %v3876_v16  ;;  %v827_v18 = vpop.permute.xlu0 %826 }
 0x167   : > { %3450 = vmatprep.mubr.msk.f32.mxu0 %vm3660_vm2, %v3659_v12  ;;  %3432 = vmatprep.subr.mxu1 %v827_v18 }
 0x168   : > { %3433 = vmatpush3.msra.mxu1 %v827_v18 }
 0x169   : > { %3434 = vmatprep.subr.mxu1 %v825_v19 }
 0x16a   : > { %3435 = vmatpush3.msra.mxu1 %v825_v19  ;;  %v821_v21 = vpop.permute.xlu0 %820 }
 0x16b   : > { %3436 = vmatprep.subr.mxu1 %v823_v20 }
 0x16c   : > { %3437 = vmatpush3.msra.mxu1 %v823_v20  ;;  %v3976_v20 = vadd.f32 %v3865_v13, %v3873_v14 }
 0x16d   : > { %3438 = vmatprep.subr.mxu1 %v821_v21 }
 0x16e   : > { %3439 = vmatpush3.msra.mxu1 %v821_v21 }
 0x16f   : > { %3441 = vmatmul.mubr.msk.f32.vlgmr.msra.gmra.mxu1 %vm734_vm1, %v3850_v8  ;;  %3458 = vmatprep.subr.mxu1 %v3659_v12 }
 0x170   : > { %3460 = vmatprep.mubr.msk.f32.mxu1 %vm3660_vm2, %v3659_v12 }
 0x226   : > { %v994_v28 = vpop.f32.mrf.mxu0 }
 0x227   : > { %v998_v29 = vmul.f32 0.35355338, %v994_v28 }
 0x228   : > { %v3447_v30 = vpop.f32.mrf.mxu0 }
 0x229   : > { %v1003_v31 = vadd.f32 %v3902_v27, %v998_v29 }
 0x22b   : > { %v1004_v32 = vsel %vm923_vm3, %v1003_v31, -inf }
 0x22c   : > { %1005 = vmax.xlane.f32.xlu1 %v1004_v32  ;;  %v3993_v32 = vld [vmem:[%s3782_s1 + $0x10] sm:$0xff] }
 0x22f   : > { %v3913_v38 = vpop.f32.mrf.mxu1 }
 0x231   : > { %v907_v40 = vpop.f32.mrf.mxu1 }
 0x23d   : > { %1090 = vrot.lane.b32.xlu1 %v3876_v16, %s3663_s21 }
 0x241   : > { %1088 = vrot.lane.b32.xlu1 %v3876_v16, %s3664_s16 }
 0x2b5   : > { %v1006_v33 = vpop.xlane.xlu1 %1005 }
 0x2b6   : > { %v1007_v34 = vsub.f32 %v1003_v31, %v1006_v33 }
 0x2b8   : > { %v1008_v35 = vmul.f32 1.442695, %v1007_v34 }
 0x2b9   : > { %v1091_v44 = vpop.permute.xlu1 %1090 }
 0x2ba   : > { %3611 = vpow2.f32 %v1008_v35 }
 0x2bd   : > { %v1089_v46 = vpop.permute.xlu1 %1088 }
 0x2c7   : > { %v3612_v36 = vpop.eup %3611 }
 0x2c8   : > { %v1010_v37 = vsel %vm923_vm3, %v3612_v36, 0.0 }
 0x2c9   : > { %1011 = vadd.xlane.f32.xlu0 %v1010_v37 }
 0x2df   : > { %832 = vrot.lane.b32.xlu0 %v3873_v14, %s3661_s26  ;;  %s3666_s26 = smov 80  }
 0x352   : > { %v1012_v39 = vpop.xlane.xlu0 %1011 }
 0x353   : > { %3613 = vrcp.f32 %v1012_v39 }
 0x356   : > { %v3915_v41 = vpop.permute.xlu0 %832 }
 0x357   : > { %v3918_v42 = vadd.f32 %v907_v40, %v3915_v41 }
 0x359   : > { %3449 = vmatpush3.msra.mxu0 %v3918_v42 }
 0x35a   : > { %3453 = vmatprep.subr.mxu0 %v3659_v12 }
 0x360   : > { %v3614_v43 = vpop.eup %3613 }
 0x361   : > { %v1014_v45 = vmul.f32 %v3614_v43, %v3612_v36 }
 0x363   : > { %3451 = vmatmul.mubr.msk.f32.vlgmr.msra.gmra.mxu0 %vm923_vm3, %v1014_v45 }
 0x364   : > { %3454 = vmatpush3.xpose.msk.msra.mxu0 %vm923_vm3, %v1091_v44  ;;  %3455 = vmatprep.mubr.msk.f32.mxu0 %vm3660_vm2, %v3659_v12 }
 0x365   : > { %3463 = vmatprep.subr.mxu0 %v3659_v12 }
 0x367   : > { %3456 = vmatmul.mubr.msk.f32.vlgmr.msra.gmra.mxu0 %vm923_vm3, %v1089_v46 }
 0x368   : > { %3465 = vmatprep.mubr.msk.f32.mxu0 %vm3660_vm2, %v3659_v12  ;;  %3464 = vmatpush3.msra.mxu0 %v3941_v60 }
 0x369   : > { %3473 = vmatprep.subr.mxu0 %v3659_v12 }
 0x423   : > { %v1084_v47 = vpop.f32.mrf.mxu0 }
 0x425   : > { %v3452_v48 = vpop.f32.mrf.mxu0 }
 0x427   : > { %v1162_v49 = vpop.f32.mrf.mxu0 }
 0x428   : > { %v1166_v50 = vmul.f32 0.35355338, %v1162_v49 }
 0x429   : > { %v3457_v51 = vpop.f32.mrf.mxu0 }
 0x42a   : > { %v1167_v52 = vadd.f32 %v1166_v50, %v3902_v27  ;;  %v4015_v51 = vld [vmem:[%s3782_s1 + $0x18] sm:$0xff] }
 0x42c   : > { %v1168_v53 = vsel %vm923_vm3, %v1167_v52, -inf }
 0x42d   : > { %1169 = vmax.xlane.f32.xlu0 %v1168_v53 }
 0x443   : > { %1180 = vrot.lane.b32.xlu0 %v3918_v42, %s3664_s16 }
 0x447   : > { %1402 = vrot.lane.b32.xlu0 %v3876_v16, %s3665_s23 }
 0x4b6   : > { %v1170_v54 = vpop.xlane.xlu0 %1169 }
 0x4b7   : > { %v1171_v55 = vsub.f32 %v1167_v52, %v1170_v54 }
 0x4b9   : > { %v1172_v56 = vmul.f32 1.442695, %v1171_v55 }
 0x4ba   : > { %v1181_v57 = vpop.permute.xlu0 %1180 }
 0x4bb   : > { %3615 = vpow2.f32 %v1172_v56  ;;  %3459 = vmatpush3.msra.mxu1 %v1181_v57 }
 0x4bc   : > { %3468 = vmatprep.subr.mxu1 %v3659_v12 }
 0x4be   : > { %v1403_v5 = vpop.permute.xlu0 %1402 }
 0x4c8   : > { %v3616_v58 = vpop.eup %3615 }
 0x4c9   : > { %v1174_v59 = vsel %vm923_vm3, %v3616_v58, 0.0 }
 0x4ca   : > { %1175 = vadd.xlane.f32.xlu1 %v1174_v59  ;;  %v4038_v59 = vadd.f32 %v3913_v38, %v3915_v41 }
 0x4db   : > { %1404 = vrot.lane.b32.xlu1 %v3876_v16, %s3666_s26 }
 0x553   : > { %v1176_v61 = vpop.xlane.xlu1 %1175 }
 0x554   : > { %3617 = vrcp.f32 %v1176_v61 }
 0x557   : > { %v1405_v2 = vpop.permute.xlu1 %1404 }
 0x561   : > { %v3618_v62 = vpop.eup %3617 }
 0x562   : > { %v1178_v63 = vmul.f32 %v3618_v62, %v3616_v58  ;;  %v1964_v58 = vsub.s32 1, %v3893_v23 }
 0x564   : > { %3461 = vmatmul.mubr.msk.f32.vlgmr.msra.gmra.mxu1 %vm923_vm3, %v1178_v63 }
 0x565   : > { %3469 = vmatpush3.msra.mxu1 %v3946_v0  ;;  %3470 = vmatprep.mubr.msk.f32.mxu1 %vm3660_vm2, %v3659_v12 }
 0x566   : > { %3478 = vmatprep.subr.mxu1 %v3659_v12 }
 0x568   : > { %3471 = vmatmul.mubr.msk.f32.vlgmr.msra.gmra.mxu1 %vm923_vm3, %v1084_v47 }
 0x569   : > { %3480 = vmatprep.mubr.msk.f32.mxu1 %vm3660_vm2, %v3659_v12 }
 0x624   : > { %v1252_v1 = vpop.f32.mrf.mxu1 }
 0x625   : > { %3466 = vmatmul.mubr.msk.f32.vlgmr.msra.gmra.mxu0 %vm923_vm3, %v1252_v1 }
 0x626   : > { %3474 = vmatpush3.xpose.msk.msra.mxu0 %vm923_vm3, %v1405_v2  ;;  %v3462_v3 = vpop.f32.mrf.mxu1  ;;  %3475 = vmatprep.mubr.msk.f32.mxu0 %vm3660_vm2, %v3659_v12 }
 0x627   : > { %3483 = vmatprep.subr.mxu0 %v3659_v12 }
 0x628   : > { %v3961_v6 = vpop.f32.mrf.mxu1 }
 0x629   : > { %3476 = vmatmul.mubr.msk.f32.vlgmr.msra.gmra.mxu0 %vm923_vm3, %v1403_v5 }
 0x62a   : > { %v3472_v7 = vpop.f32.mrf.mxu1  ;;  %3485 = vmatprep.mubr.msk.f32.mxu0 %vm3660_vm2, %v3659_v12  ;;  %3484 = vmatpush3.msra.mxu0 %v3993_v32 }
 0x62b   : > { %3493 = vmatprep.subr.mxu0 %v3659_v12 }
 0x6e5   : > { %v3966_v9 = vpop.f32.mrf.mxu0 }
 0x6e7   : > { %v3467_v10 = vpop.f32.mrf.mxu0 }
 0x6e9   : > { %v1476_v11 = vpop.f32.mrf.mxu0 }
 0x6ea   : > { %v1480_v15 = vmul.f32 0.35355338, %v1476_v11 }
 0x6eb   : > { %v3477_v17 = vpop.f32.mrf.mxu0 }
 0x6ec   : > { %v1481_v18 = vadd.f32 %v1480_v15, %v3902_v27 }
 0x6ee   : > { %v1482_v19 = vsel %vm923_vm3, %v1481_v18, -inf }
 0x6ef   : > { %1483 = vmax.xlane.f32.xlu1 %v1482_v19 }
 0x700   : > { %1645 = vrot.lane.b32.xlu1 %v3876_v16, %s3667_s30 }
 0x704   : > { %1643 = vrot.lane.b32.xlu1 %v3876_v16, %s3668_s27 }
 0x708   : > { %1885 = vrot.lane.b32.xlu1 %v3976_v20, %s3662_s25  ;;  %s4226_s25 = scalar_lea.vmem %s4195_s6, %s3767_s15 }
 0x778   : > { %v1484_v21 = vpop.xlane.xlu1 %1483 }
 0x779   : > { %v1485_v22 = vsub.f32 %v1481_v18, %v1484_v21 }
 0x77b   : > { %v1486_v24 = vmul.f32 1.442695, %v1485_v22 }
 0x77c   : > { %v1646_v14 = vpop.permute.xlu1 %1645 }
 0x77d   : > { %3619 = vpow2.f32 %v1486_v24 }
 0x780   : > { %v1644_v31 = vpop.permute.xlu1 %1643 }
 0x784   : > { %v1886_v52 = vpop.permute.xlu1 %1885 }
 0x78a   : > { %v3620_v26 = vpop.eup %3619 }
 0x78b   : > { %v1488_v28 = vsel %vm923_vm3, %v3620_v26, 0.0 }
 0x78c   : > { %1489 = vadd.xlane.f32.xlu0 %v1488_v28 }
 0x7a2   : > { %1493 = vrot.lane.b32.xlu0 %v3918_v42, %s3665_s23 }
 0x815   : > { %v1490_v16 = vpop.xlane.xlu0 %1489 }
 0x816   : > { %3621 = vrcp.f32 %v1490_v16 }
 0x819   : > { %v1494_v29 = vpop.permute.xlu0 %1493 }
 0x81a   : > { %3479 = vmatpush3.msra.mxu1 %v1494_v29 }
 0x81b   : > { %3488 = vmatprep.subr.mxu1 %v3659_v12 }
 0x823   : > { %v3622_v13 = vpop.eup %3621 }
 0x824   : > { %v1492_v30 = vmul.f32 %v3622_v13, %v3620_v26 }
 0x826   : > { %3481 = vmatmul.mubr.msk.f32.vlgmr.msra.gmra.mxu1 %vm923_vm3, %v1492_v30 }
 0x827   : > { %3489 = vmatpush3.xpose.msk.msra.mxu1 %vm923_vm3, %v1646_v14  ;;  %3490 = vmatprep.mubr.msk.f32.mxu1 %vm3660_vm2, %v3659_v12 }
 0x828   : > { %3498 = vmatprep.subr.mxu1 %v3659_v12 }
 0x82a   : > { %3491 = vmatmul.mubr.msk.f32.vlgmr.msra.gmra.mxu1 %vm923_vm3, %v1644_v31 }
 0x82b   : > { %3500 = vmatprep.mubr.msk.f32.mxu1 %vm3660_vm2, %v3659_v12  ;;  %3499 = vmatpush3.msra.mxu1 %v4015_v51 }
 0x82c   : > { %3508 = vmatprep.subr.mxu1 %v3659_v12 }
 0x8e6   : > { %v1565_v33 = vpop.f32.mrf.mxu1 }
 0x8e7   : > { %3486 = vmatmul.mubr.msk.f32.vlgmr.msra.gmra.mxu0 %vm923_vm3, %v1565_v33 }
 0x8e8   : > { %v3482_v34 = vpop.f32.mrf.mxu1  ;;  %3495 = vmatprep.mubr.msk.f32.mxu0 %vm3660_vm2, %v3659_v12 }
 0x8ea   : > { %v1717_v35 = vpop.f32.mrf.mxu1 }
 0x8eb   : > { %v1721_v36 = vmul.f32 0.35355338, %v1717_v35 }
 0x8ec   : > { %v3492_v37 = vpop.f32.mrf.mxu1 }
 0x8ed   : > { %v1722_v39 = vadd.f32 %v1721_v36, %v3902_v27 }
 0x8ef   : > { %v1723_v40 = vsel %vm923_vm3, %v1722_v39, -inf }
 0x8f0   : > { %1724 = vmax.xlane.f32.xlu0 %v1723_v40 }
 0x906   : > { %1734 = vrot.lane.b32.xlu0 %v3918_v42, %s3668_s27  ;;  %v1399_v42 = vadd.f32 %v3961_v6, %v3966_v9 }
 0x90a   : > { %2053 = vrot.lane.b32.xlu0 %v3976_v20, %s3663_s21 }
 0x979   : > { %v1725_v43 = vpop.xlane.xlu0 %1724 }
 0x97a   : > { %v1726_v44 = vsub.f32 %v1722_v39, %v1725_v43 }
 0x97c   : > { %v1727_v45 = vmul.f32 1.442695, %v1726_v44 }
 0x97d   : > { %v1735_v46 = vpop.permute.xlu0 %1734 }
 0x97e   : > { %3623 = vpow2.f32 %v1727_v45  ;;  %3494 = vmatpush3.msra.mxu0 %v1735_v46 }
 0x97f   : > { %3503 = vmatprep.subr.mxu0 %v3659_v12 }
 0x981   : > { %v2054_v56 = vpop.permute.xlu0 %2053 }
 0x98b   : > { %v3624_v47 = vpop.eup %3623 }
 0x98c   : > { %v1729_v27 = vsel %vm923_vm3, %v3624_v47, 0.0 }
 0x98d   : > { %1730 = vadd.xlane.f32.xlu1 %v1729_v27 }
 0x99e   : > { %2051 = vrot.lane.b32.xlu1 %v3976_v20, %s3664_s16 }
 0x9a7   : > { %v1638_v48 = vpop.f32.mrf.mxu0 }
 0x9a8   : > { %v4012_v49 = vadd.f32 %v1638_v48, %v1399_v42 }
 0x9a9   : > { %v3487_v50 = vpop.f32.mrf.mxu0 }
 0xa16   : > { %v1731_v53 = vpop.xlane.xlu1 %1730 }
 0xa17   : > { %3625 = vrcp.f32 %v1731_v53 }
 0xa1a   : > { %v2052_v57 = vpop.permute.xlu1 %2051 }
 0xa24   : > { %v3626_v54 = vpop.eup %3625 }
 0xa25   : > { %v1733_v55 = vmul.f32 %v3626_v54, %v3624_v47 }
 0xa27   : > { %3496 = vmatmul.mubr.msk.f32.vlgmr.msra.gmra.mxu0 %vm923_vm3, %v1733_v55 }
 0xa28   : > { %3504 = vmatpush3.xpose.msk.msra.mxu0 %vm923_vm3, %v1886_v52  ;;  %3505 = vmatprep.mubr.msk.f32.mxu0 %vm3660_vm2, %v3659_v12 }
 0xa29   : > { %3513 = vmatprep.subr.mxu0 %v3659_v12 }
 0xa2b   : > { %3506 = vmatmul.mubr.msk.f32.vlgmr.msra.gmra.mxu0 %vm923_vm3, %v3976_v20 }
 0xa2c   : > { %3514 = vmatpush3.xpose.msk.msra.mxu0 %vm923_vm3, %v2054_v56  ;;  %3515 = vmatprep.mubr.msk.f32.mxu0 %vm3660_vm2, %v3659_v12 }
 0xa2d   : > { %3523 = vmatprep.subr.mxu0 %v3659_v12 }
 0xa2f   : > { %3516 = vmatmul.mubr.msk.f32.vlgmr.msra.gmra.mxu0 %vm923_vm3, %v2052_v57 }
 0xa30   : > { %3524 = vmatpush3.msra.mxu0 %v3941_v60  ;;  %3525 = vmatprep.mubr.msk.f32.mxu0 %vm3660_vm2, %v3659_v12  ;;  %v4045_v60 = vrot.slane %v3898_v25, %v1964_v58 }
 0xa31   : > { %3533 = vmatprep.subr.mxu0 %v3659_v12 }
 0xae7   : > { %v1806_v61 = vpop.f32.mrf.mxu0 }
 0xae8   : > { %3501 = vmatmul.mubr.msk.f32.vlgmr.msra.gmra.mxu1 %vm923_vm3, %v1806_v61 }
 0xae9   : > { %3509 = vmatpush3.msra.mxu1 %v4038_v59  ;;  %v3497_v62 = vpop.f32.mrf.mxu0  ;;  %3510 = vmatprep.mubr.msk.f32.mxu1 %vm3660_vm2, %v3659_v12 }
 0xaea   : > { %3518 = vmatprep.subr.mxu1 %v3659_v12 }
 0xaeb   : > { %v1957_v63 = vpop.f32.mrf.mxu0 }
 0xaec   : > { %v1961_v23 = vmul.f32 0.35355338, %v1957_v63 }
 0xaed   : > { %v3507_v1 = vpop.f32.mrf.mxu0 }
 0xaee   : > { %v1966_v38 = vadd.f32 %v4045_v60, %v1961_v23 }
 0xaef   : > { %v2125_v41 = vpop.f32.mrf.mxu0 }
 0xaf0   : > { %v2129_v2 = vmul.f32 0.35355338, %v2125_v41  ;;  %v1967_v3 = vsel %vm923_vm3, %v1966_v38, -inf }
 0xaf1   : > { %1968 = vmax.xlane.f32.xlu0 %v1967_v3  ;;  %v3517_v5 = vpop.f32.mrf.mxu0 }
 0xaf2   : > { %v2130_v6 = vadd.f32 %v2129_v2, %v4045_v60 }
 0xaf4   : > { %v2131_v7 = vsel %vm923_vm3, %v2130_v6, -inf }
 0xaf5   : > { %2132 = vmax.xlane.f32.xlu1 %v2131_v7 }
 0xb06   : > { %2143 = vrot.lane.b32.xlu1 %v4038_v59, %s3664_s16 }
 0xb0a   : > { %2365 = vrot.lane.b32.xlu1 %v3976_v20, %s3665_s23 }
 0xb7a   : > { %v1969_v25 = vpop.xlane.xlu0 %1968 }
 0xb7b   : > { %v1970_v9 = vsub.f32 %v1966_v38, %v1969_v25 }
 0xb7d   : > { %v1971_v10 = vmul.f32 1.442695, %v1970_v9 }
 0xb7e   : > { %v2133_v11 = vpop.xlane.xlu1 %2132 }
 0xb7f   : > { %3627 = vpow2.f32 %v1971_v10  ;;  %v2134_v15 = vsub.f32 %v2130_v6, %v2133_v11 }
 0xb81   : > { %v2135_v17 = vmul.f32 1.442695, %v2134_v15 }
 0xb82   : > { %v2144_v30 = vpop.permute.xlu1 %2143 }
 0xb83   : > { %3629 = vpow2.f32 %v2135_v17 }
 0xb8c   : > { %v3628_v18 = vpop.eup %3627 }
 0xb8d   : > { %v1973_v19 = vsel %vm923_vm3, %v3628_v18, 0.0 }
 0xb8e   : > { %1974 = vadd.xlane.f32.xlu0 %v1973_v19 }
 0xb90   : > { %v3630_v21 = vpop.eup %3629 }
 0xb91   : > { %v2137_v22 = vsel %vm923_vm3, %v3630_v21, 0.0 }
 0xb92   : > { %2138 = vadd.xlane.f32.xlu0 %v2137_v22 }
 0xba8   : > { %v1879_v24 = vpop.f32.mrf.mxu1  ;;  %2367 = vrot.lane.b32.xlu0 %v3976_v20, %s3666_s26 }
 0xba9   : > { %v4061_v26 = vadd.f32 %v1879_v24, %v4012_v49 }
 0xbaa   : > { %v3502_v28 = vpop.f32.mrf.mxu1 }
 0xc17   : > { %v1975_v16 = vpop.xlane.xlu0 %1974 }
 0xc18   : > { %3631 = vrcp.f32 %v1975_v16 }
 0xc1b   : > { %v2139_v29 = vpop.xlane.xlu0 %2138 }
 0xc1c   : > { %3633 = vrcp.f32 %v2139_v29 }
 0xc1f   : > { %v2368_v37 = vpop.permute.xlu0 %2367 }
 0xc25   : > { %v3632_v13 = vpop.eup %3631 }
 0xc26   : > { %v1977_v14 = vmul.f32 %v3632_v13, %v3628_v18 }
 0xc28   : > { %3511 = vmatmul.mubr.msk.f32.vlgmr.msra.gmra.mxu1 %vm923_vm3, %v1977_v14 }
 0xc29   : > { %v3634_v31 = vpop.eup %3633  ;;  %3519 = vmatpush3.msra.mxu1 %v2144_v30  ;;  %3520 = vmatprep.mubr.msk.f32.mxu1 %vm3660_vm2, %v3659_v12 }
 0xc2a   : > { %v2141_v33 = vmul.f32 %v3634_v31, %v3630_v21  ;;  %3528 = vmatprep.subr.mxu1 %v3659_v12 }
 0xc2c   : > { %3521 = vmatmul.mubr.msk.f32.vlgmr.msra.gmra.mxu1 %vm923_vm3, %v2141_v33 }
 0xc2d   : > { %3529 = vmatpush3.msra.mxu1 %v3946_v0  ;;  %3530 = vmatprep.mubr.msk.f32.mxu1 %vm3660_vm2, %v3659_v12  ;;  %v2366_v0 = vpop.permute.xlu1 %2365 }
 0xc2e   : > { %3538 = vmatprep.subr.mxu1 %v3659_v12 }
 0xce8   : > { %v2047_v34 = vpop.f32.mrf.mxu1 }
 0xce9   : > { %3531 = vmatmul.mubr.msk.f32.vlgmr.msra.gmra.mxu1 %vm923_vm3, %v2047_v34 }
 0xcea   : > { %v3512_v35 = vpop.f32.mrf.mxu1  ;;  %3540 = vmatprep.mubr.msk.f32.mxu1 %vm3660_vm2, %v3659_v12 }
 0xcec   : > { %v2215_v36 = vpop.f32.mrf.mxu1 }
 0xced   : > { %3526 = vmatmul.mubr.msk.f32.vlgmr.msra.gmra.mxu0 %vm923_vm3, %v2215_v36 }
 0xcee   : > { %3534 = vmatpush3.xpose.msk.msra.mxu0 %vm923_vm3, %v2368_v37  ;;  %v3522_v39 = vpop.f32.mrf.mxu1  ;;  %3535 = vmatprep.mubr.msk.f32.mxu0 %vm3660_vm2, %v3659_v12 }
 0xcef   : > { %3543 = vmatprep.subr.mxu0 %v3659_v12 }
 0xcf1   : > { %3536 = vmatmul.mubr.msk.f32.vlgmr.msra.gmra.mxu0 %vm923_vm3, %v2366_v0 }
 0xcf2   : > { %3544 = vmatpush3.msra.mxu0 %v3993_v32  ;;  %3545 = vmatprep.mubr.msk.f32.mxu0 %vm3660_vm2, %v3659_v12 }
 0xcf3   : > { %3553 = vmatprep.subr.mxu0 %v3659_v12 }
 0xda9   : > { %v2361_v40 = vpop.f32.mrf.mxu1 }
 0xdab   : > { %v3532_v43 = vpop.f32.mrf.mxu1 }
 0xdad   : > { %v2288_v44 = vpop.f32.mrf.mxu0 }
 0xdae   : > { %v2362_v45 = vadd.f32 %v2361_v40, %v2288_v44  ;;  %v3329_v44 = vld [vmem:[%s696_s24] ss:$0 sm:$0xff]  ;;  %s4227_s24 = sld [smem:[#allocation9_spill]] }
 0xdaf   : > { %v3527_v46 = vpop.f32.mrf.mxu0 }
 0xdb0   : > { %v3330_v46 = vld [vmem:[%s699_s7] ss:$0 sm:$0xff] }
 0xdb1   : > { %v2439_v47 = vpop.f32.mrf.mxu0 }
 0xdb2   : > { %v2443_v27 = vmul.f32 0.35355338, %v2439_v47 }
 0xdb3   : > { %v3537_v42 = vpop.f32.mrf.mxu0 }
 0xdb4   : > { %v2444_v48 = vadd.f32 %v2443_v27, %v4045_v60  ;;  %v2906_v42 = vld [vmem:[%s3791_s2 + $0x18] sm:$0xff]  ;;  %s4228_s16 = scalar_lea.vmem %s4227_s24, %s3767_s15 }
 0xdb6   : > { %v2445_v49 = vsel %vm923_vm3, %v2444_v48, -inf }
 0xdb7   : > { %2446 = vmax.xlane.f32.xlu1 %v2445_v49  ;;  %v2904_v49 = vld [vmem:[%s3791_s2 + $0x8] sm:$0xff] }
 0xdc8   : > { %2608 = vrot.lane.b32.xlu1 %v3976_v20, %s3667_s30 }
 0xdcc   : > { %2606 = vrot.lane.b32.xlu1 %v3976_v20, %s3668_s27 }
 0xe40   : > { %v2447_v32 = vpop.xlane.xlu1 %2446 }
 0xe41   : > { %v2448_v50 = vsub.f32 %v2444_v48, %v2447_v32  ;;  %v2905_v48 = vld [vmem:[%s3791_s2 + $0x10] sm:$0xff]  ;;  %v2903_v32 = vld [vmem:[%s3791_s2] sm:$0xff] }
 0xe43   : > { %v2449_v52 = vmul.f32 1.442695, %v2448_v50  ;;  %v3004_v50 = vld [vmem:[%s3801_s18 + $0x38] sm:$0xff] }
 0xe44   : > { %v2609_v58 = vpop.permute.xlu1 %2608 }
 0xe45   : > { %3635 = vpow2.f32 %v2449_v52  ;;  %v3003_v52 = vld [vmem:[%s3801_s18 + $0x30] sm:$0xff] }
 0xe48   : > { %v2607_v61 = vpop.permute.xlu1 %2606 }
 0xe52   : > { %v3636_v53 = vpop.eup %3635 }
 0xe53   : > { %v2451_v54 = vsel %vm923_vm3, %v3636_v53, 0.0 }
 0xe54   : > { %2452 = vadd.xlane.f32.xlu0 %v2451_v54  ;;  %v3001_v54 = vld [vmem:[%s3801_s18 + $0x20] sm:$0xff] }
 0xe6a   : > { %2456 = vrot.lane.b32.xlu0 %v4038_v59, %s3665_s23 }
 0xedd   : > { %v2453_v55 = vpop.xlane.xlu0 %2452 }
 0xede   : > { %3637 = vrcp.f32 %v2453_v55 }
 0xee1   : > { %v2457_v56 = vpop.permute.xlu0 %2456 }
 0xee2   : > { %3539 = vmatpush3.msra.mxu1 %v2457_v56 }
 0xee3   : > { %3548 = vmatprep.subr.mxu1 %v3659_v12 }
 0xeeb   : > { %v3638_v57 = vpop.eup %3637 }
 0xeec   : > { %v2455_v20 = vmul.f32 %v3638_v57, %v3636_v53  ;;  %v3002_v53 = vld [vmem:[%s3801_s18 + $0x28] sm:$0xff] }
 0xeee   : > { %3541 = vmatmul.mubr.msk.f32.vlgmr.msra.gmra.mxu1 %vm923_vm3, %v2455_v20 }
 0xeef   : > { %3549 = vmatpush3.xpose.msk.msra.mxu1 %vm923_vm3, %v2609_v58  ;;  %3550 = vmatprep.mubr.msk.f32.mxu1 %vm3660_vm2, %v3659_v12 }
 0xef0   : > { %3558 = vmatprep.subr.mxu1 %v3659_v12 }
 0xef2   : > { %3551 = vmatmul.mubr.msk.f32.vlgmr.msra.gmra.mxu1 %vm923_vm3, %v2607_v61 }
 0xef3   : > { %3559 = vmatpush3.msra.mxu1 %v4015_v51  ;;  %3560 = vmatprep.mubr.msk.f32.mxu1 %vm3660_vm2, %v3659_v12 }
 0xef4   : > { %3574 = vmatprep.subr.mxu1 %v3004_v50 }
 0xfae   : > { %v2528_v62 = vpop.f32.mrf.mxu1 }
 0xfaf   : > { %3546 = vmatmul.mubr.msk.f32.vlgmr.msra.gmra.mxu0 %vm923_vm3, %v2528_v62 }
 0xfb0   : > { %v3542_v63 = vpop.f32.mrf.mxu1  ;;  %3555 = vmatprep.mubr.msk.f32.mxu0 %vm3660_vm2, %v3659_v12  ;;  %v3328_v12 = vld [vmem:[%s4226_s25] ss:$0 sm:$0xff] }
 0xfb1   : > { %v2854_v7 = vadd.f32 %v3328_v12, %v4061_v26  ;;  %v3000_v63 = vld [vmem:[%s3801_s18 + $0x18] sm:$0xff] }
 0xfb2   : > { %v2680_v23 = vpop.f32.mrf.mxu1 }
 0xfb3   : > { %v2684_v1 = vmul.f32 0.35355338, %v2680_v23  ;;  %v2856_v9 = vadd.f32 %v2854_v7, %v3840_v4  ;;  %v2999_v23 = vld [vmem:[%s3801_s18 + $0x10] sm:$0xff]  ;;  %v3334_v7 = vld [vmem:[%s693_s20] ss:$0 sm:$0xff] }
 0xfb4   : > { %v3552_v38 = vpop.f32.mrf.mxu1 }
 0xfb5   : > { %v2685_v41 = vadd.f32 %v2684_v1, %v4045_v60  ;;  %v2998_v1 = vld [vmem:[%s3801_s18 + $0x8] sm:$0xff]  ;;  %v2997_v38 = vld [vmem:[%s3801_s18] sm:$0xff] }
 0xfb7   : > { %v2686_v2 = vsel %vm923_vm3, %v2685_v41, -inf }
 0xfb8   : > { %2687 = vmax.xlane.f32.xlu0 %v2686_v2 }
 0xfce   : > { %2697 = vrot.lane.b32.xlu0 %v4038_v59, %s3668_s27  ;;  %v2858_v59 = vsel %vm734_vm1, %v2856_v9, 0.0 }
0x1041   : > { %v2688_v51 = vpop.xlane.xlu0 %2687 }
0x1042   : > { %v2689_v3 = vsub.f32 %v2685_v41, %v2688_v51  ;;  %v3331_v41 = vld [vmem:[%s4228_s16] ss:$0 sm:$0xff] }
0x1044   : > { %v2690_v5 = vmul.f32 1.442695, %v2689_v3 }
0x1045   : > { %v2698_v6 = vpop.permute.xlu0 %2697 }
0x1046   : > { %3639 = vpow2.f32 %v2690_v5  ;;  %3554 = vmatpush3.msra.mxu0 %v2698_v6 }
0x1047   : > { %3563 = vmatprep.subr.mxu0 %v2906_v42 }
0x1053   : > { %v3640_v60 = vpop.eup %3639 }
0x1054   : > { %v2692_v25 = vsel %vm923_vm3, %v3640_v60, 0.0 }
0x1055   : > { %2693 = vadd.xlane.f32.xlu1 %v2692_v25 }
0x1059   : > { %2859 = vadd.xlane.f32.xlu1 %v2858_v59 }
0x106f   : > { %v2601_v10 = vpop.f32.mrf.mxu0 }
0x1070   : > { %v2605_v11 = vadd.f32 %v2601_v10, %v2362_v45 }
0x1071   : > { %v3547_v15 = vpop.f32.mrf.mxu0 }
0x10de   : > { %v2694_v17 = vpop.xlane.xlu1 %2693 }
0x10df   : > { %3641 = vrcp.f32 %v2694_v17 }
0x10e2   : > { %v2860_v24 = vpop.xlane.xlu1 %2859 }
0x10e3   : > { %v2865_v26 = vmul.f32 0.03125, %v2860_v24 }
0x10e5   : > { %v2867_v29 = vsub.f32 %v2856_v9, %v2865_v26 }
0x10e7   : > { %v2869_v31 = vmul.f32 %v2867_v29, %v2867_v29 }
0x10e9   : > { %v2871_v33 = vsel %vm734_vm1, %v2869_v31, 0.0 }
0x10ec   : > { %v3642_v18 = vpop.eup %3641 }
0x10ed   : > { %v2696_v19 = vmul.f32 %v3642_v18, %v3640_v60 }
0x10ef   : > { %3556 = vmatmul.mubr.msk.f32.vlgmr.msra.gmra.mxu0 %vm923_vm3, %v2696_v19 }
0x10f0   : > { %3564 = vmatpush3.msra.mxu0 %v2906_v42 }
0x10f1   : > { %3565 = vmatprep.subr.mxu0 %v2905_v48 }
0x10f2   : > { %3566 = vmatpush3.msra.mxu0 %v2905_v48 }
0x10f3   : > { %3567 = vmatprep.subr.mxu0 %v2904_v49 }
0x10f4   : > { %3568 = vmatpush3.msra.mxu0 %v2904_v49 }
0x10f5   : > { %3569 = vmatprep.subr.mxu0 %v2903_v32 }
0x10f6   : > { %3570 = vmatpush3.msra.mxu0 %v2903_v32 }
0x11af   : > { %v2769_v21 = vpop.f32.mrf.mxu0 }
0x11b0   : > { %3561 = vmatmul.mubr.msk.f32.vlgmr.msra.gmra.mxu1 %vm923_vm3, %v2769_v21 }
0x11b1   : > { %v3557_v22 = vpop.f32.mrf.mxu0  ;;  %3575 = vmatpush3.msra.mxu1 %v3004_v50 }
0x11b2   : > { %3576 = vmatprep.subr.mxu1 %v3003_v52 }
0x11b3   : > { %3577 = vmatpush3.msra.mxu1 %v3003_v52 }
0x11b4   : > { %3578 = vmatprep.subr.mxu1 %v3002_v53 }
0x11b5   : > { %3579 = vmatpush3.msra.mxu1 %v3002_v53 }
0x11b6   : > { %3580 = vmatprep.subr.mxu1 %v3001_v54 }
0x11b7   : > { %3581 = vmatpush3.msra.mxu1 %v3001_v54 }
0x11b8   : > { %3582 = vmatprep.subr.mxu1 %v3000_v63 }
0x11b9   : > { %3583 = vmatpush3.msra.mxu1 %v3000_v63 }
0x11ba   : > { %3584 = vmatprep.subr.mxu1 %v2999_v23 }
0x11bb   : > { %3585 = vmatpush3.msra.mxu1 %v2999_v23 }
0x11bc   : > { %3586 = vmatprep.subr.mxu1 %v2998_v1 }
0x11bd   : > { %3587 = vmatpush3.msra.mxu1 %v2998_v1 }
0x11be   : > { %3588 = vmatprep.subr.mxu1 %v2997_v38 }
0x11bf   : > { %3589 = vmatpush3.msra.mxu1 %v2997_v38 }
0x1270   : > { %v2842_v4 = vpop.f32.mrf.mxu1 }
0x1271   : > { %v2846_v28 = vadd.f32 %v2842_v4, %v2605_v11 }
0x1272   : > { %v3562_v16 = vpop.f32.mrf.mxu1 }
0x1273   : > { %v2855_v13 = vadd.f32 %v3328_v12, %v2846_v28 }
0x1275   : > { %v2857_v14 = vadd.f32 %v2855_v13, %v3850_v8 }
0x1277   : > { %v2861_v30 = vsel %vm734_vm1, %v2857_v14, 0.0 }
0x1278   : > { %2862 = vadd.xlane.f32.xlu1 %v2861_v30 }
0x127c   : > { %2872 = vadd.xlane.f32.xlu1 %v2871_v33 }
0x1301   : > { %v2863_v34 = vpop.xlane.xlu1 %2862 }
0x1302   : > { %v2866_v35 = vmul.f32 0.03125, %v2863_v34 }
0x1304   : > { %v2868_v36 = vsub.f32 %v2857_v14, %v2866_v35 }
0x1305   : > { %v2873_v37 = vpop.xlane.xlu1 %2872 }
0x1306   : > { %v2877_v39 = vmul.f32 0.03125, %v2873_v37  ;;  %v2870_v0 = vmul.f32 %v2868_v36, %v2868_v36 }
0x1308   : > { %v2879_v40 = vadd.f32 1e-05, %v2877_v39  ;;  %v2874_v8 = vsel %vm734_vm1, %v2870_v0, 0.0  ;;  %v3338_v39 = vld [vmem:[%s705_s28] ss:$0 sm:$0xff] }
0x1309   : > { %2875 = vadd.xlane.f32.xlu1 %v2874_v8 }
0x130a   : > { %3643 = vrsqrt.f32 %v2879_v40 }
0x1317   : > { %v3644_v43 = vpop.eup %3643 }
0x1318   : > { %v2883_v45 = vmul.f32 %v3644_v43, %v2867_v29 }
0x131a   : > { %v2892_v47 = vmul.f32 %v3329_v44, %v2883_v45 }
0x131c   : > { %v4136_v27 = vadd.f32 %v3330_v46, %v2892_v47 }
0x131e   : > { %3571 = vmatprep.mubr.msk.f32.mxu0 %vm734_vm1, %v4136_v27 }
0x1392   : > { %v2876_v55 = vpop.xlane.xlu1 %2875 }
0x1393   : > { %v2878_v56 = vmul.f32 0.03125, %v2876_v55 }
0x1395   : > { %v2880_v57 = vadd.f32 1e-05, %v2878_v56 }
0x1397   : > { %3645 = vrsqrt.f32 %v2880_v57 }
0x13a4   : > { %v3646_v58 = vpop.eup %3645 }
0x13a5   : > { %v2884_v20 = vmul.f32 %v3646_v58, %v2868_v36  ;;  %v3337_v36 = vld [vmem:[%s702_s29] ss:$0 sm:$0xff] }
0x13a7   : > { %v2893_v61 = vmul.f32 %v3329_v44, %v2884_v20 }
0x13a9   : > { %v2902_v62 = vadd.f32 %v3330_v46, %v2893_v61 }
0x13ab   : > { %3572 = vmatmul.mubr.msk.f32.vlgmr.msra.gmra.mxu0 %vm734_vm1, %v2902_v62 }
0x146b   : > { %v3573_v2 = vpop.f32.mrf.mxu0 }
0x146c   : > { %v2992_v51 = vadd.f32 %v3573_v2, %v3331_v41 }
0x146d   : > { %v2986_v3 = vpop.f32.mrf.mxu0 }
0x146e   : > { %v2987_v5 = vadd.f32 %v3331_v41, %v2986_v3  ;;  %v2996_v12 = vmax.f32 %v2992_v51, 0.0 }
0x1470   : > { %v2995_v6 = vmax.f32 %v2987_v5, 0.0 }
0x1472   : > { %3590 = vmatprep.mubr.msk.f32.mxu1 %vm3012_vm4, %v2995_v6 }
0x1473   : > { %3591 = vmatmul.mubr.msk.f32.vlgmr.msra.gmra.mxu1 %vm3012_vm4, %v2996_v12 }
0x1533   : > { %v3592_v60 = vpop.f32.mrf.mxu1 }
0x1534   : > { %v3091_v25 = vadd.f32 %v3592_v60, %v3334_v7 }
0x1535   : > { %v3085_v9 = vpop.f32.mrf.mxu1 }
0x1536   : > { %v3086_v59 = vadd.f32 %v3334_v7, %v3085_v9  ;;  %v3095_v10 = vadd.f32 %v3091_v25, %v2902_v62 }
0x1538   : > { %v3099_v11 = vsel %vm734_vm1, %v3095_v10, 0.0  ;;  %v3094_v15 = vadd.f32 %v3086_v59, %v4136_v27 }
0x1539   : > { %3100 = vadd.xlane.f32.xlu0 %v3099_v11 }
0x153a   : > { %v3096_v17 = vsel %vm734_vm1, %v3094_v15, 0.0 }
0x153b   : > { %3097 = vadd.xlane.f32.xlu1 %v3096_v17 }
0x15c2   : > { %v3101_v18 = vpop.xlane.xlu0 %3100 }
0x15c3   : > { %v3103_v19 = vmul.f32 0.03125, %v3101_v18 }
0x15c4   : > { %v3098_v21 = vpop.xlane.xlu1 %3097 }
0x15c5   : > { %v3102_v22 = vmul.f32 0.03125, %v3098_v21  ;;  %v3105_v24 = vsub.f32 %v3095_v10, %v3103_v19 }
0x15c7   : > { %v3104_v26 = vsub.f32 %v3094_v15, %v3102_v22  ;;  %v3107_v16 = vmul.f32 %v3105_v24, %v3105_v24 }
0x15c9   : > { %v3106_v4 = vmul.f32 %v3104_v26, %v3104_v26  ;;  %v3111_v29 = vsel %vm734_vm1, %v3107_v16, 0.0 }
0x15cb   : > { %v3108_v28 = vsel %vm734_vm1, %v3106_v4, 0.0 }
0x15cc   : > { %3109 = vadd.xlane.f32.xlu1 %v3108_v28 }
0x15d0   : > { %3112 = vadd.xlane.f32.xlu1 %v3111_v29 }
0x1655   : > { %v3110_v13 = vpop.xlane.xlu1 %3109 }
0x1656   : > { %v3114_v14 = vmul.f32 0.03125, %v3110_v13 }
0x1658   : > { %v3116_v30 = vadd.f32 1e-05, %v3114_v14 }
0x1659   : > { %v3113_v31 = vpop.xlane.xlu1 %3112 }
0x165a   : > { %3647 = vrsqrt.f32 %v3116_v30  ;;  %v3115_v33 = vmul.f32 0.03125, %v3113_v31 }
0x165c   : > { %v3117_v34 = vadd.f32 1e-05, %v3115_v33 }
0x165e   : > { %3649 = vrsqrt.f32 %v3117_v34 }
0x1667   : > { %v3648_v35 = vpop.eup %3647 }
0x1668   : > { %v3120_v37 = vmul.f32 %v3648_v35, %v3104_v26 }
0x166a   : > { %v3129_v0 = vmul.f32 %v3337_v36, %v3120_v37 }
0x166b   : > { %v3650_v40 = vpop.eup %3649 }
0x166c   : > { %v3138_v8 = vadd.f32 %v3338_v39, %v3129_v0  ;;  %v3121_v43 = vmul.f32 %v3650_v40, %v3105_v24 }
0x166e   : > { %3140 = vst.msk [vmem:[%s4206_s17] sm:$0xff] %vm734_vm1, %v3138_v8  ;;  %v3130_v44 = vmul.f32 %v3337_v36, %v3121_v43 }
0x1670   : > { %v3139_v45 = vadd.f32 %v3338_v39, %v3130_v44 }
0x1672   : > { %3141 = vst.msk [vmem:[%s4206_s17 + $0x8] sm:$0xff] %vm734_vm1, %v3139_v45 }
0x1673 PF: > { %s4229_s3 = sld [smem:[#allocation2_spill]] }
0x1679   : > { %s27_s24 = sadd.s32 1, %s4229_s3  }
0x167a   : > { %p24_p5 = scmp.ge.s32.totalorder %s27_s24, 5  }
0x167c   :  { %26 = sbr.rel (!%p24_p5) target bundleno = 8 (0x8), region = 151 }

</bundles_post_ra>
